<compile_context>
chip_gen: v6e
topology: v6e:2x2x1
jax: 0.10.0
libtpu: 0.0.40
codegen_flags: <defaults>
</compile_context>

<pallas_src>
import math
import numpy as np
import jax
import jax.numpy as jnp
from jax import lax
from jax.experimental import pallas as pl
from jax.experimental.pallas import tpu as pltpu

# ---- problem sizes implied by the module ------------------------------------
B = 2
H = W = 9          # conv1 k=3 s=2 -> 4x4 ; conv2 k=2 s=1 -> 3x3 ; 32*3*3 = 288
C_IN = 27
GOAL = 12
ACTION_SPACE = [100, 6, 4, 4, 4, 4, 7, 49]
N_ACT = sum(ACTION_SPACE)          # 178
H1 = 4                              # conv1 output spatial
H2 = 3                              # conv2 output spatial
N_POS = H2 * H2                     # 9 conv2 output positions
N_TAP = 4                           # 2x2 conv2 taps
OUT_PAD = 256                       # lane-dense output width (actor 0:178, critic 178)


# ---- deterministic orthogonal init (mirrors torch layer_init) ----------------
def orthogonal_init(key, shape, gain):
    rows = shape[0]
    cols = int(np.prod(shape[1:])) if len(shape) > 1 else 1
    a = jax.random.normal(key, (max(rows, cols), min(rows, cols)), dtype=jnp.float32)
    q, r = jnp.linalg.qr(a)
    q = q * jnp.sign(jnp.diagonal(r))[None, :]
    if rows < cols:
        q = q.T
    return (gain * q[:rows, :cols]).reshape(shape).astype(jnp.float32)


def make_params(key):
    ks = jax.random.split(key, 7)
    s2 = math.sqrt(2.0)
    P = {
        "W1": orthogonal_init(ks[0], (16, C_IN, 3, 3), s2), "b1": jnp.zeros((16,), jnp.float32),
        "W2": orthogonal_init(ks[1], (32, 16, 2, 2), s2),   "b2": jnp.zeros((32,), jnp.float32),
        "Wf": orthogonal_init(ks[2], (256, 32 * 3 * 3), s2), "bf": jnp.zeros((256,), jnp.float32),
        "Wa1": orthogonal_init(ks[3], (64, 256 + GOAL), s2), "ba1": jnp.zeros((64,), jnp.float32),
        "Wa2": orthogonal_init(ks[4], (N_ACT, 64), 0.01),    "ba2": jnp.zeros((N_ACT,), jnp.float32),
        "Wc1": orthogonal_init(ks[5], (64, 256 + GOAL), s2), "bc1": jnp.zeros((64,), jnp.float32),
        "Wc2": orthogonal_init(ks[6], (1, 64), 1.0),          "bc2": jnp.zeros((1,), jnp.float32),
    }
    return P


# ---- one-time weight re-layout (hoisted out of the per-call path) -------------
def prepare_params(P):
    # conv1 weight as im2col columns, row order (kh, kw, cin)
    w1 = jnp.transpose(P["W1"], (2, 3, 1, 0)).reshape(3 * 3 * C_IN, 16)      # (243, 16)
    # conv2 weight as 4 stacked tap matrices, row order (tap, cin)
    w2 = jnp.transpose(P["W2"], (2, 3, 1, 0)).reshape(N_TAP * 16, 32)        # (64, 32)
    # fc1 weight: torch flatten order is (c, h, w); kernel row order is (pos=(h,w), c)
    wf = jnp.transpose(P["Wf"].reshape(256, 32, H2, H2), (2, 3, 1, 0)).reshape(N_POS * 32, 256)
    # heads: split obs-concat (hid | goal) and fuse actor|critic horizontally to 128 lanes
    wh1_hid = jnp.concatenate([P["Wa1"].T[:256], P["Wc1"].T[:256]], axis=1)  # (256, 128)
    wh1_gl = jnp.concatenate([P["Wa1"].T[256:], P["Wc1"].T[256:]], axis=1)   # (12, 128)
    bh1 = jnp.concatenate([P["ba1"], P["bc1"]]).reshape(1, 128)
    # second layers fused into one lane-dense (128, 256): actor cols 0:178, critic col 178
    w2c = jnp.zeros((128, OUT_PAD), jnp.float32)
    w2c = w2c.at[:64, :N_ACT].set(P["Wa2"].T)
    w2c = w2c.at[64:, N_ACT].set(P["Wc2"][0])
    b2c = jnp.zeros((1, OUT_PAD), jnp.float32)
    b2c = b2c.at[0, :N_ACT].set(P["ba2"])
    b2c = b2c.at[0, N_ACT].set(P["bc2"][0])
    return dict(
        w1=w1, b1=P["b1"].reshape(1, 16),
        w2=w2, b2=P["b2"].reshape(1, 32),
        wf=wf, bf=P["bf"].reshape(1, 256),
        wh1_hid=wh1_hid, wh1_gl=wh1_gl, bh1=bh1,
        w2c=w2c, b2c=b2c,
    )


# ---- wrapper-side im2col (outside the kernel) ---------------------------------
def _im2col_conv1_taps(x_pad):
    """x_pad: (BP, 9, 9, 27) -> (N_TAP * N_POS * BP, 243) patch matrix.

    Row order (tap=(dh,dw), conv2-pos=(oi2,oj2), batch); column order (kh, kw, c).
    Row (t, p, b) holds the conv1 patch for conv1 output position
    (oi2+dh, oj2+dw), i.e. exactly the input conv2 tap t needs at position p,
    so the kernel only ever takes contiguous, sublane-aligned row slices.
    """
    BP = x_pad.shape[0]
    r = 2 * np.arange(H1)[:, None] + np.arange(3)[None, :]          # (4, 3): oi1, kh -> input row
    p = x_pad[:, r]                                                  # (BP, 4, 3, 9, 27)  (b, oi1, kh, w, c)
    q = p[:, :, :, r]                                                # (BP, 4, 3, 4, 3, 27) (b, oi1, kh, oj1, kw, c)
    q = jnp.transpose(q, (0, 1, 3, 2, 4, 5))                         # (b, oi1, oj1, kh, kw, c)
    patches = q.reshape(BP, H1, H1, 3 * 3 * C_IN)                    # (BP, 4, 4, 243)

    widx = np.arange(2)[:, None] + np.arange(H2)[None, :]            # (2, 3): dh, oi2 -> oi1
    wp = patches[:, widx]                                            # (BP, 2, 3, 4, 243) (b, dh, oi2, oj1, k)
    wp = wp[:, :, :, widx]                                           # (BP, 2, 3, 2, 3, 243) (b, dh, oi2, dw, oj2, k)
    wp = jnp.transpose(wp, (1, 3, 2, 4, 0, 5))                       # (dh, dw, oi2, oj2, b, k)
    return wp.reshape(N_TAP * N_POS * BP, 3 * 3 * C_IN)


# ---- the Pallas kernel --------------------------------------------------------
def workernet_kernel(p1_ref, g_ref,
                     w1_ref, b1_ref, w2_ref, b2_ref,
                     wf_ref, bf_ref,
                     wh1h_ref, wh1g_ref, bh1_ref,
                     w2c_ref, b2c_ref,
                     out_ref):
    BP = g_ref.shape[0]
    rows_per_tap = N_POS * BP                                        # multiple of 8 -> aligned slices

    # conv1 (27 -> 16, k=3, s=2) + ReLU: ONE fused MXU matmul over all rows.
    c1 = jnp.maximum(
        jnp.dot(p1_ref[...], w1_ref[...], preferred_element_type=jnp.float32)
        + b1_ref[...], 0.0)                                          # (4*9*BP, 16)

    # conv2 (16 -> 32, k=2, s=1) + ReLU: tap-wise accumulation, 4 matmuls,
    # contiguous sublane-aligned row slices, no concats.
    w2 = w2_ref[...]
    acc2 = None
    for t in range(N_TAP):
        c1_t = c1[t * rows_per_tap:(t + 1) * rows_per_tap, :]        # (9*BP, 16)
        w2_t = w2[t * 16:(t + 1) * 16, :]                            # (16, 32)
        d = jnp.dot(c1_t, w2_t, preferred_element_type=jnp.float32)
        acc2 = d if acc2 is None else acc2 + d
    c2 = jnp.maximum(acc2 + b2_ref[...], 0.0)                        # (9*BP, 32), rows (pos, batch)

    # Flatten + Linear(288 -> 256) + ReLU: position-wise accumulation (9 matmuls),
    # avoids any sublane->lane relayout of the conv2 output.
    wf = wf_ref[...]
    acch = None
    for p in range(N_POS):
        c2_p = c2[p * BP:(p + 1) * BP, :]                            # (BP, 32)
        wf_p = wf[p * 32:(p + 1) * 32, :]                            # (32, 256)
        d = jnp.dot(c2_p, wf_p, preferred_element_type=jnp.float32)
        acch = d if acch is None else acch + d
    hid = jnp.maximum(acch + bf_ref[...], 0.0)                       # (BP, 256)

    # Heads: obs = cat(hid, g) concat eliminated via split weights;
    # actor/critic first layers fused into one exactly-128-lane result.
    h1 = jnp.maximum(
        jnp.dot(hid, wh1h_ref[...], preferred_element_type=jnp.float32)
        + jnp.dot(g_ref[...], wh1g_ref[...], preferred_element_type=jnp.float32)
        + bh1_ref[...], 0.0)                                         # (BP, 128) = [actor_h | critic_h]

    # Fused second layers -> single lane-dense (BP, 256) output store
    # (actor logits in [:, :178], critic value in [:, 178], rest zero-bias pad).
    out_ref[...] = (jnp.dot(h1, w2c_ref[...], preferred_element_type=jnp.float32)
                    + b2c_ref[...])


# ---- wrapper: pad batch, build patches, call the kernel ------------------------
def workernet_forward(x_nhwc, g, KP):
    Bn = x_nhwc.shape[0]
    BP = max(8, ((Bn + 7) // 8) * 8)                                 # fill all 8 sublanes
    x_pad = jnp.zeros((BP, H, W, C_IN), jnp.float32).at[:Bn].set(x_nhwc)
    g_pad = jnp.zeros((BP, GOAL), jnp.float32).at[:Bn].set(g)
    p1 = _im2col_conv1_taps(x_pad)                                   # (4*9*BP, 243)

    args = (p1, g_pad,
            KP["w1"], KP["b1"], KP["w2"], KP["b2"],
            KP["wf"], KP["bf"],
            KP["wh1_hid"], KP["wh1_gl"], KP["bh1"],
            KP["w2c"], KP["b2c"])
    vmem = pl.BlockSpec(memory_space=pltpu.MemorySpace.VMEM)
    # No grid / tiling: < 1 MiB resident, per review a grid only adds overhead here.
    # (A batch-tile grid with dimension_semantics=("parallel",) only pays off on
    #  v7x once the effective batch is much larger.)
    out = pl.pallas_call(
        workernet_kernel,
        out_shape=jax.ShapeDtypeStruct((BP, OUT_PAD), jnp.float32),
        in_specs=[vmem] * len(args),
        out_specs=vmem,
    )(*args)
    actor = out[:Bn, :N_ACT]
    critic = out[:Bn, N_ACT:N_ACT + 1]
    return actor, critic


workernet_forward_jit = jax.jit(workernet_forward)


# ---- pure-JAX reference (mirrors the PyTorch forward) -------------------------
def ref_forward(x_nhwc, g, P):
    xc = jnp.transpose(x_nhwc, (0, 3, 1, 2))                         # NCHW
    dn = ("NCHW", "OIHW", "NCHW")
    y = lax.conv_general_dilated(xc, P["W1"], (2, 2), "VALID", dimension_numbers=dn)
    y = jnp.maximum(y + P["b1"][None, :, None, None], 0.0)
    y = lax.conv_general_dilated(y, P["W2"], (1, 1), "VALID", dimension_numbers=dn)
    y = jnp.maximum(y + P["b2"][None, :, None, None], 0.0)
    y = y.reshape(y.shape[0], -1)                                    # (B, C*H*W) like nn.Flatten
    h = jnp.maximum(y @ P["Wf"].T + P["bf"], 0.0)
    obs = jnp.concatenate([h, g], axis=1)
    actor = jnp.maximum(obs @ P["Wa1"].T + P["ba1"], 0.0) @ P["Wa2"].T + P["ba2"]
    critic = jnp.maximum(obs @ P["Wc1"].T + P["bc1"], 0.0) @ P["Wc2"].T + P["bc2"]
    return actor, critic


if __name__ == "__main__":
    key = jax.random.PRNGKey(0)
    kp, kx, kg = jax.random.split(key, 3)
    params = make_params(kp)
    kparams = prepare_params(params)                                 # one-time weight re-layout
    x = jax.random.normal(kx, (B, H, W, C_IN), dtype=jnp.float32)    # NHWC, as fed to forward()
    g = jax.random.normal(kg, (B, GOAL), dtype=jnp.float32)

    actor, critic = jax.block_until_ready(workernet_forward_jit(x, g, kparams))
    actor_ref, critic_ref = jax.block_until_ready(ref_forward(x, g, params))

    assert actor.shape == (B, N_ACT) and critic.shape == (B, 1)
    np.testing.assert_allclose(np.asarray(actor), np.asarray(actor_ref), rtol=1e-3, atol=1e-3)
    np.testing.assert_allclose(np.asarray(critic), np.asarray(critic_ref), rtol=1e-3, atol=1e-3)
    print("KERNEL_OK")
</pallas_src>

<mosaic_0001>
module attributes {stable_mosaic.version = 11 : i64} {
  func.func @workernet_kernel(%arg0: memref<288x243xf32, #tpu.memory_space<vmem>>, %arg1: memref<8x12xf32, #tpu.memory_space<vmem>>, %arg2: memref<243x16xf32, #tpu.memory_space<vmem>>, %arg3: memref<1x16xf32, #tpu.memory_space<vmem>>, %arg4: memref<64x32xf32, #tpu.memory_space<vmem>>, %arg5: memref<1x32xf32, #tpu.memory_space<vmem>>, %arg6: memref<288x256xf32, #tpu.memory_space<vmem>>, %arg7: memref<1x256xf32, #tpu.memory_space<vmem>>, %arg8: memref<256x128xf32, #tpu.memory_space<vmem>>, %arg9: memref<12x128xf32, #tpu.memory_space<vmem>>, %arg10: memref<1x128xf32, #tpu.memory_space<vmem>>, %arg11: memref<128x256xf32, #tpu.memory_space<vmem>>, %arg12: memref<1x256xf32, #tpu.memory_space<vmem>>, %arg13: memref<8x256xf32, #tpu.memory_space<vmem>>) attributes {dimension_semantics = [], scalar_prefetch = 0 : i64, scratch_operands = 0 : i64, tpu.core_type = #tpu.core_type<tc>} {
    %c0 = arith.constant 0 : index
    %c0_0 = arith.constant 0 : index
    %0 = vector.load %arg0[%c0, %c0_0] : memref<288x243xf32, #tpu.memory_space<vmem>>, vector<288x243xf32>
    %c0_1 = arith.constant 0 : index
    %c0_2 = arith.constant 0 : index
    %1 = vector.load %arg2[%c0_1, %c0_2] : memref<243x16xf32, #tpu.memory_space<vmem>>, vector<243x16xf32>
    %cst = arith.constant dense<0.000000e+00> : vector<288x16xf32>
    %2 = tpu.matmul %0, %1, %cst {dimension_numbers = #tpu.dot_dimension_numbers<[1], [0], [0], [1], [0, 0, 1, 1], [], []>} : vector<288x243xf32>, vector<243x16xf32>, vector<288x16xf32> -> vector<288x16xf32>
    %c0_3 = arith.constant 0 : index
    %c0_4 = arith.constant 0 : index
    %3 = vector.load %arg3[%c0_3, %c0_4] : memref<1x16xf32, #tpu.memory_space<vmem>>, vector<1x16xf32>
    %4 = vector.broadcast %3 : vector<1x16xf32> to vector<288x16xf32>
    %5 = arith.addf %2, %4 : vector<288x16xf32>
    %cst_5 = arith.constant 0.000000e+00 : f32
    %6 = vector.broadcast %cst_5 : f32 to vector<288x16xf32>
    %7 = arith.maximumf %5, %6 : vector<288x16xf32>
    %c0_6 = arith.constant 0 : index
    %c0_7 = arith.constant 0 : index
    %8 = vector.load %arg4[%c0_6, %c0_7] : memref<64x32xf32, #tpu.memory_space<vmem>>, vector<64x32xf32>
    %9 = vector.extract_strided_slice %7 {offsets = [0, 0], sizes = [72, 16], strides = [1, 1]} : vector<288x16xf32> to vector<72x16xf32>
    %10 = vector.extract_strided_slice %8 {offsets = [0, 0], sizes = [16, 32], strides = [1, 1]} : vector<64x32xf32> to vector<16x32xf32>
    %cst_8 = arith.constant dense<0.000000e+00> : vector<72x32xf32>
    %11 = tpu.matmul %9, %10, %cst_8 {dimension_numbers = #tpu.dot_dimension_numbers<[1], [0], [0], [1], [0, 0, 1, 1], [], []>} : vector<72x16xf32>, vector<16x32xf32>, vector<72x32xf32> -> vector<72x32xf32>
    %12 = vector.extract_strided_slice %7 {offsets = [72, 0], sizes = [72, 16], strides = [1, 1]} : vector<288x16xf32> to vector<72x16xf32>
    %13 = vector.extract_strided_slice %8 {offsets = [16, 0], sizes = [16, 32], strides = [1, 1]} : vector<64x32xf32> to vector<16x32xf32>
    %cst_9 = arith.constant dense<0.000000e+00> : vector<72x32xf32>
    %14 = tpu.matmul %12, %13, %cst_9 {dimension_numbers = #tpu.dot_dimension_numbers<[1], [0], [0], [1], [0, 0, 1, 1], [], []>} : vector<72x16xf32>, vector<16x32xf32>, vector<72x32xf32> -> vector<72x32xf32>
    %15 = arith.addf %11, %14 : vector<72x32xf32>
    %16 = vector.extract_strided_slice %7 {offsets = [144, 0], sizes = [72, 16], strides = [1, 1]} : vector<288x16xf32> to vector<72x16xf32>
    %17 = vector.extract_strided_slice %8 {offsets = [32, 0], sizes = [16, 32], strides = [1, 1]} : vector<64x32xf32> to vector<16x32xf32>
    %cst_10 = arith.constant dense<0.000000e+00> : vector<72x32xf32>
    %18 = tpu.matmul %16, %17, %cst_10 {dimension_numbers = #tpu.dot_dimension_numbers<[1], [0], [0], [1], [0, 0, 1, 1], [], []>} : vector<72x16xf32>, vector<16x32xf32>, vector<72x32xf32> -> vector<72x32xf32>
    %19 = arith.addf %15, %18 : vector<72x32xf32>
    %20 = vector.extract_strided_slice %7 {offsets = [216, 0], sizes = [72, 16], strides = [1, 1]} : vector<288x16xf32> to vector<72x16xf32>
    %21 = vector.extract_strided_slice %8 {offsets = [48, 0], sizes = [16, 32], strides = [1, 1]} : vector<64x32xf32> to vector<16x32xf32>
    %cst_11 = arith.constant dense<0.000000e+00> : vector<72x32xf32>
    %22 = tpu.matmul %20, %21, %cst_11 {dimension_numbers = #tpu.dot_dimension_numbers<[1], [0], [0], [1], [0, 0, 1, 1], [], []>} : vector<72x16xf32>, vector<16x32xf32>, vector<72x32xf32> -> vector<72x32xf32>
    %23 = arith.addf %19, %22 : vector<72x32xf32>
    %c0_12 = arith.constant 0 : index
    %c0_13 = arith.constant 0 : index
    %24 = vector.load %arg5[%c0_12, %c0_13] : memref<1x32xf32, #tpu.memory_space<vmem>>, vector<1x32xf32>
    %25 = vector.broadcast %24 : vector<1x32xf32> to vector<72x32xf32>
    %26 = arith.addf %23, %25 : vector<72x32xf32>
    %cst_14 = arith.constant 0.000000e+00 : f32
    %27 = vector.broadcast %cst_14 : f32 to vector<72x32xf32>
    %28 = arith.maximumf %26, %27 : vector<72x32xf32>
    %c0_15 = arith.constant 0 : index
    %c0_16 = arith.constant 0 : index
    %29 = vector.load %arg6[%c0_15, %c0_16] : memref<288x256xf32, #tpu.memory_space<vmem>>, vector<288x256xf32>
    %30 = vector.extract_strided_slice %28 {offsets = [0, 0], sizes = [8, 32], strides = [1, 1]} : vector<72x32xf32> to vector<8x32xf32>
    %31 = vector.extract_strided_slice %29 {offsets = [0, 0], sizes = [32, 256], strides = [1, 1]} : vector<288x256xf32> to vector<32x256xf32>
    %cst_17 = arith.constant dense<0.000000e+00> : vector<8x256xf32>
    %32 = tpu.matmul %30, %31, %cst_17 {dimension_numbers = #tpu.dot_dimension_numbers<[1], [0], [0], [1], [0, 0, 1, 1], [], []>} : vector<8x32xf32>, vector<32x256xf32>, vector<8x256xf32> -> vector<8x256xf32>
    %33 = vector.extract_strided_slice %28 {offsets = [8, 0], sizes = [8, 32], strides = [1, 1]} : vector<72x32xf32> to vector<8x32xf32>
    %34 = vector.extract_strided_slice %29 {offsets = [32, 0], sizes = [32, 256], strides = [1, 1]} : vector<288x256xf32> to vector<32x256xf32>
    %cst_18 = arith.constant dense<0.000000e+00> : vector<8x256xf32>
    %35 = tpu.matmul %33, %34, %cst_18 {dimension_numbers = #tpu.dot_dimension_numbers<[1], [0], [0], [1], [0, 0, 1, 1], [], []>} : vector<8x32xf32>, vector<32x256xf32>, vector<8x256xf32> -> vector<8x256xf32>
    %36 = arith.addf %32, %35 : vector<8x256xf32>
    %37 = vector.extract_strided_slice %28 {offsets = [16, 0], sizes = [8, 32], strides = [1, 1]} : vector<72x32xf32> to vector<8x32xf32>
    %38 = vector.extract_strided_slice %29 {offsets = [64, 0], sizes = [32, 256], strides = [1, 1]} : vector<288x256xf32> to vector<32x256xf32>
    %cst_19 = arith.constant dense<0.000000e+00> : vector<8x256xf32>
    %39 = tpu.matmul %37, %38, %cst_19 {dimension_numbers = #tpu.dot_dimension_numbers<[1], [0], [0], [1], [0, 0, 1, 1], [], []>} : vector<8x32xf32>, vector<32x256xf32>, vector<8x256xf32> -> vector<8x256xf32>
    %40 = arith.addf %36, %39 : vector<8x256xf32>
    %41 = vector.extract_strided_slice %28 {offsets = [24, 0], sizes = [8, 32], strides = [1, 1]} : vector<72x32xf32> to vector<8x32xf32>
    %42 = vector.extract_strided_slice %29 {offsets = [96, 0], sizes = [32, 256], strides = [1, 1]} : vector<288x256xf32> to vector<32x256xf32>
    %cst_20 = arith.constant dense<0.000000e+00> : vector<8x256xf32>
    %43 = tpu.matmul %41, %42, %cst_20 {dimension_numbers = #tpu.dot_dimension_numbers<[1], [0], [0], [1], [0, 0, 1, 1], [], []>} : vector<8x32xf32>, vector<32x256xf32>, vector<8x256xf32> -> vector<8x256xf32>
    %44 = arith.addf %40, %43 : vector<8x256xf32>
    %45 = vector.extract_strided_slice %28 {offsets = [32, 0], sizes = [8, 32], strides = [1, 1]} : vector<72x32xf32> to vector<8x32xf32>
    %46 = vector.extract_strided_slice %29 {offsets = [128, 0], sizes = [32, 256], strides = [1, 1]} : vector<288x256xf32> to vector<32x256xf32>
    %cst_21 = arith.constant dense<0.000000e+00> : vector<8x256xf32>
    %47 = tpu.matmul %45, %46, %cst_21 {dimension_numbers = #tpu.dot_dimension_numbers<[1], [0], [0], [1], [0, 0, 1, 1], [], []>} : vector<8x32xf32>, vector<32x256xf32>, vector<8x256xf32> -> vector<8x256xf32>
    %48 = arith.addf %44, %47 : vector<8x256xf32>
    %49 = vector.extract_strided_slice %28 {offsets = [40, 0], sizes = [8, 32], strides = [1, 1]} : vector<72x32xf32> to vector<8x32xf32>
    %50 = vector.extract_strided_slice %29 {offsets = [160, 0], sizes = [32, 256], strides = [1, 1]} : vector<288x256xf32> to vector<32x256xf32>
    %cst_22 = arith.constant dense<0.000000e+00> : vector<8x256xf32>
    %51 = tpu.matmul %49, %50, %cst_22 {dimension_numbers = #tpu.dot_dimension_numbers<[1], [0], [0], [1], [0, 0, 1, 1], [], []>} : vector<8x32xf32>, vector<32x256xf32>, vector<8x256xf32> -> vector<8x256xf32>
    %52 = arith.addf %48, %51 : vector<8x256xf32>
    %53 = vector.extract_strided_slice %28 {offsets = [48, 0], sizes = [8, 32], strides = [1, 1]} : vector<72x32xf32> to vector<8x32xf32>
    %54 = vector.extract_strided_slice %29 {offsets = [192, 0], sizes = [32, 256], strides = [1, 1]} : vector<288x256xf32> to vector<32x256xf32>
    %cst_23 = arith.constant dense<0.000000e+00> : vector<8x256xf32>
    %55 = tpu.matmul %53, %54, %cst_23 {dimension_numbers = #tpu.dot_dimension_numbers<[1], [0], [0], [1], [0, 0, 1, 1], [], []>} : vector<8x32xf32>, vector<32x256xf32>, vector<8x256xf32> -> vector<8x256xf32>
    %56 = arith.addf %52, %55 : vector<8x256xf32>
    %57 = vector.extract_strided_slice %28 {offsets = [56, 0], sizes = [8, 32], strides = [1, 1]} : vector<72x32xf32> to vector<8x32xf32>
    %58 = vector.extract_strided_slice %29 {offsets = [224, 0], sizes = [32, 256], strides = [1, 1]} : vector<288x256xf32> to vector<32x256xf32>
    %cst_24 = arith.constant dense<0.000000e+00> : vector<8x256xf32>
    %59 = tpu.matmul %57, %58, %cst_24 {dimension_numbers = #tpu.dot_dimension_numbers<[1], [0], [0], [1], [0, 0, 1, 1], [], []>} : vector<8x32xf32>, vector<32x256xf32>, vector<8x256xf32> -> vector<8x256xf32>
    %60 = arith.addf %56, %59 : vector<8x256xf32>
    %61 = vector.extract_strided_slice %28 {offsets = [64, 0], sizes = [8, 32], strides = [1, 1]} : vector<72x32xf32> to vector<8x32xf32>
    %62 = vector.extract_strided_slice %29 {offsets = [256, 0], sizes = [32, 256], strides = [1, 1]} : vector<288x256xf32> to vector<32x256xf32>
    %cst_25 = arith.constant dense<0.000000e+00> : vector<8x256xf32>
    %63 = tpu.matmul %61, %62, %cst_25 {dimension_numbers = #tpu.dot_dimension_numbers<[1], [0], [0], [1], [0, 0, 1, 1], [], []>} : vector<8x32xf32>, vector<32x256xf32>, vector<8x256xf32> -> vector<8x256xf32>
    %64 = arith.addf %60, %63 : vector<8x256xf32>
    %c0_26 = arith.constant 0 : index
    %c0_27 = arith.constant 0 : index
    %65 = vector.load %arg7[%c0_26, %c0_27] : memref<1x256xf32, #tpu.memory_space<vmem>>, vector<1x256xf32>
    %66 = vector.broadcast %65 : vector<1x256xf32> to vector<8x256xf32>
    %67 = arith.addf %64, %66 : vector<8x256xf32>
    %cst_28 = arith.constant 0.000000e+00 : f32
    %68 = vector.broadcast %cst_28 : f32 to vector<8x256xf32>
    %69 = arith.maximumf %67, %68 : vector<8x256xf32>
    %c0_29 = arith.constant 0 : index
    %c0_30 = arith.constant 0 : index
    %70 = vector.load %arg8[%c0_29, %c0_30] : memref<256x128xf32, #tpu.memory_space<vmem>>, vector<256x128xf32>
    %cst_31 = arith.constant dense<0.000000e+00> : vector<8x128xf32>
    %71 = tpu.matmul %69, %70, %cst_31 {dimension_numbers = #tpu.dot_dimension_numbers<[1], [0], [0], [1], [0, 0, 1, 1], [], []>} : vector<8x256xf32>, vector<256x128xf32>, vector<8x128xf32> -> vector<8x128xf32>
    %c0_32 = arith.constant 0 : index
    %c0_33 = arith.constant 0 : index
    %72 = vector.load %arg1[%c0_32, %c0_33] : memref<8x12xf32, #tpu.memory_space<vmem>>, vector<8x12xf32>
    %c0_34 = arith.constant 0 : index
    %c0_35 = arith.constant 0 : index
    %73 = vector.load %arg9[%c0_34, %c0_35] : memref<12x128xf32, #tpu.memory_space<vmem>>, vector<12x128xf32>
    %cst_36 = arith.constant dense<0.000000e+00> : vector<8x128xf32>
    %74 = tpu.matmul %72, %73, %cst_36 {dimension_numbers = #tpu.dot_dimension_numbers<[1], [0], [0], [1], [0, 0, 1, 1], [], []>} : vector<8x12xf32>, vector<12x128xf32>, vector<8x128xf32> -> vector<8x128xf32>
    %75 = arith.addf %71, %74 : vector<8x128xf32>
    %c0_37 = arith.constant 0 : index
    %c0_38 = arith.constant 0 : index
    %76 = vector.load %arg10[%c0_37, %c0_38] : memref<1x128xf32, #tpu.memory_space<vmem>>, vector<1x128xf32>
    %77 = vector.broadcast %76 : vector<1x128xf32> to vector<8x128xf32>
    %78 = arith.addf %75, %77 : vector<8x128xf32>
    %cst_39 = arith.constant 0.000000e+00 : f32
    %79 = vector.broadcast %cst_39 : f32 to vector<8x128xf32>
    %80 = arith.maximumf %78, %79 : vector<8x128xf32>
    %c0_40 = arith.constant 0 : index
    %c0_41 = arith.constant 0 : index
    %81 = vector.load %arg11[%c0_40, %c0_41] : memref<128x256xf32, #tpu.memory_space<vmem>>, vector<128x256xf32>
    %cst_42 = arith.constant dense<0.000000e+00> : vector<8x256xf32>
    %82 = tpu.matmul %80, %81, %cst_42 {dimension_numbers = #tpu.dot_dimension_numbers<[1], [0], [0], [1], [0, 0, 1, 1], [], []>} : vector<8x128xf32>, vector<128x256xf32>, vector<8x256xf32> -> vector<8x256xf32>
    %c0_43 = arith.constant 0 : index
    %c0_44 = arith.constant 0 : index
    %83 = vector.load %arg12[%c0_43, %c0_44] : memref<1x256xf32, #tpu.memory_space<vmem>>, vector<1x256xf32>
    %84 = vector.broadcast %83 : vector<1x256xf32> to vector<8x256xf32>
    %85 = arith.addf %82, %84 : vector<8x256xf32>
    %c0_45 = arith.constant 0 : index
    %c0_46 = arith.constant 0 : index
    %86 = vector.load %arg13[%c0_45, %c0_46] : memref<8x256xf32, #tpu.memory_space<vmem>>, vector<8x256xf32>
    tpu.vector_store %arg13[%c0_45, %c0_46], %85 {strides = array<i32>} : memref<8x256xf32, #tpu.memory_space<vmem>>, vector<8x256xf32>,
    return
  }
}

</mosaic_0001>

<bundles_post_ra>
// kernel: workernet_forward.1
= control target key start
LH: loop header
LB: loop body
LE: loop exit
PB: predicated region body
PF: predicated region fallthrough
CT: control target
= control target key end

     0   :  { %v2532_v0 = vmov 0.0   ;;  %vm154_vm0 = vcmask 941056   ;;  %vm263_vm1 = vcmask 1042432   ;;  %vm2533_vm2 = vmmov 0   ;;  %s3706_s2 = inlined_call_operand.vmem [shape: f32[243,16], index: 2, kind: input, shape index: {}]   ;;  %s3707_s0 = inlined_call_operand.vmem [shape: f32[288,243], index: 0, kind: input, shape index: {}]   ;;  %s3708_s4 = inlined_call_operand.vmem [shape: f32[64,32], index: 4, kind: input, shape index: {}]   ;;  %s3709_s3 = inlined_call_operand.vmem [shape: f32[1,16], index: 3, kind: input, shape index: {}]   ;;  %s3710_s6 = inlined_call_operand.vmem [shape: f32[288,256], index: 6, kind: input, shape index: {}]   ;;  %s3711_s5 = inlined_call_operand.vmem [shape: f32[1,32], index: 5, kind: input, shape index: {}]   ;;  %s3712_s8 = inlined_call_operand.vmem [shape: f32[256,128], index: 8, kind: input, shape index: {}]   ;;  %s3713_s9 = inlined_call_operand.vmem [shape: f32[12,128], index: 9, kind: input, shape index: {}]   ;;  %s3714_s1 = inlined_call_operand.vmem [shape: f32[8,12], index: 1, kind: input, shape index: {}]   ;;  %s3715_s11 = inlined_call_operand.vmem [shape: f32[128,256], index: 11, kind: input, shape index: {}]   ;;  %s3716_s7 = inlined_call_operand.vmem [shape: f32[1,256], index: 7, kind: input, shape index: {}]   ;;  %s3717_s10 = inlined_call_operand.vmem [shape: f32[1,128], index: 10, kind: input, shape index: {}]   ;;  %s3718_s12 = inlined_call_operand.vmem [shape: f32[1,256], index: 12, kind: input, shape index: {}]   ;;  %s3719_s13 = inlined_call_operand.vmem [shape: f32[8,256], index: 13, kind: output, shape index: {}]  }
   0x1   :  { %267 = vmatprep.subr.mxu0 %v2532_v0  ;;  %v131_v1 = vld [vmem:[%s3706_s2 + $0x78] sm:$0xff]  ;;  %v130_v2 = vld [vmem:[%s3706_s2 + $0x70] sm:$0xff]  ;;  %2399 = vmatprep.subr.mxu1 %v2532_v0  ;;  %v129_v3 = vld [vmem:[%s3706_s2 + $0x68] sm:$0xff]  ;;  %vm556_vm3 = vcmask 130048   ;;  %vm1220_vm4 = vcmask 261120   ;;  %vm1956_vm5 = vcmask 1043456  }
   0x2   :  { %268 = vmatpush1.msra.mxu0 %v131_v1  ;;  %v128_v4 = vld [vmem:[%s3706_s2 + $0x60] sm:$0xff]  ;;  %v127_v5 = vld [vmem:[%s3706_s2 + $0x58] sm:$0xff]  ;;  %v126_v6 = vld [vmem:[%s3706_s2 + $0x50] sm:$0xff]  ;;  %2403 = vmatprep.mubr.msk.f32.mxu1 %vm2533_vm2, %v2532_v0  ;;  %vm1952_vm6 = vcmask 97280  }
   0x3   :  { %269 = vmatprep.subr.mxu0 %v2532_v0  ;;  %v125_v7 = vld [vmem:[%s3706_s2 + $0x48] sm:$0xff]  ;;  %v124_v9 = vld [vmem:[%s3706_s2 + $0x40] sm:$0xff]  ;;  %v123_v10 = vld [vmem:[%s3706_s2 + $0x38] sm:$0xff] }
   0x4   :  { %270 = vmatpush1.msra.mxu0 %v130_v2  ;;  %v45_v8 = vld [vmem:[%s3707_s0 + $0x8] sm:$0xff]  ;;  %v122_v11 = vld [vmem:[%s3706_s2 + $0x30] sm:$0xff]  ;;  %v120_v13 = vld [vmem:[%s3706_s2 + $0x20] sm:$0xff] }
   0x5   :  { %271 = vmatprep.subr.mxu0 %v2532_v0  ;;  %2232 = vmatprep.mubr.msk.f32.mxu0 %vm154_vm0, %v45_v8  ;;  %v121_v12 = vld [vmem:[%s3706_s2 + $0x28] sm:$0xff]  ;;  %v119_v14 = vld [vmem:[%s3706_s2 + $0x18] sm:$0xff]  ;;  %v118_v15 = vld [vmem:[%s3706_s2 + $0x10] sm:$0xff] }
   0x6   :  { %272 = vmatpush1.msra.mxu0 %v129_v3  ;;  %v117_v16 = vld [vmem:[%s3706_s2 + $0x8] sm:$0xff]  ;;  %v116_v17 = vld [vmem:[%s3706_s2] sm:$0xff]  ;;  %v146_v18 = vld [vmem:[%s3706_s2 + $0xf0] sm:$0x7] }
   0x7   :  { %273 = vmatprep.subr.mxu0 %v2532_v0  ;;  %v145_v19 = vld [vmem:[%s3706_s2 + $0xe8] sm:$0xff]  ;;  %v144_v20 = vld [vmem:[%s3706_s2 + $0xe0] sm:$0xff]  ;;  %v143_v21 = vld [vmem:[%s3706_s2 + $0xd8] sm:$0xff] }
   0x8   :  { %274 = vmatpush1.msra.mxu0 %v128_v4  ;;  %v142_v22 = vld [vmem:[%s3706_s2 + $0xd0] sm:$0xff]  ;;  %v141_v23 = vld [vmem:[%s3706_s2 + $0xc8] sm:$0xff]  ;;  %v140_v24 = vld [vmem:[%s3706_s2 + $0xc0] sm:$0xff] }
   0x9   :  { %275 = vmatprep.subr.mxu0 %v2532_v0  ;;  %v139_v25 = vld [vmem:[%s3706_s2 + $0xb8] sm:$0xff]  ;;  %v138_v26 = vld [vmem:[%s3706_s2 + $0xb0] sm:$0xff]  ;;  %v137_v27 = vld [vmem:[%s3706_s2 + $0xa8] sm:$0xff] }
   0xa   :  { %276 = vmatpush1.msra.mxu0 %v127_v5  ;;  %v136_v28 = vld [vmem:[%s3706_s2 + $0xa0] sm:$0xff]  ;;  %v135_v29 = vld [vmem:[%s3706_s2 + $0x98] sm:$0xff]  ;;  %v134_v30 = vld [vmem:[%s3706_s2 + $0x90] sm:$0xff] }
   0xb   :  { %277 = vmatprep.subr.mxu0 %v2532_v0  ;;  %v133_v31 = vld [vmem:[%s3706_s2 + $0x88] sm:$0xff]  ;;  %v132_v32 = vld [vmem:[%s3706_s2 + $0x80] sm:$0xff]  ;;  %v47_v34 = vld [vmem:[%s3707_s0 + $0x18] sm:$0xff] }
   0xc   :  { %278 = vmatpush1.msra.mxu0 %v126_v6  ;;  %v44_v33 = vld [vmem:[%s3707_s0] sm:$0xff]  ;;  %v46_v35 = vld [vmem:[%s3707_s0 + $0x10] sm:$0xff]  ;;  %v49_v36 = vld [vmem:[%s3707_s0 + $0x28] sm:$0xff] }
   0xd   :  { %279 = vmatprep.subr.mxu0 %v2532_v0  ;;  %v48_v37 = vld [vmem:[%s3707_s0 + $0x20] sm:$0xff]  ;;  %v51_v38 = vld [vmem:[%s3707_s0 + $0x38] sm:$0xff]  ;;  %v50_v39 = vld [vmem:[%s3707_s0 + $0x30] sm:$0xff] }
   0xe   :  { %280 = vmatpush1.msra.mxu0 %v125_v7  ;;  %v53_v40 = vld [vmem:[%s3707_s0 + $0x48] sm:$0xff]  ;;  %v52_v41 = vld [vmem:[%s3707_s0 + $0x40] sm:$0xff]  ;;  %v55_v42 = vld [vmem:[%s3707_s0 + $0x58] sm:$0xff] }
   0xf   :  { %281 = vmatprep.subr.mxu0 %v2532_v0  ;;  %v54_v43 = vld [vmem:[%s3707_s0 + $0x50] sm:$0xff]  ;;  %v57_v44 = vld [vmem:[%s3707_s0 + $0x68] sm:$0xff]  ;;  %v56_v45 = vld [vmem:[%s3707_s0 + $0x60] sm:$0xff] }
  0x10   :  { %282 = vmatpush1.msra.mxu0 %v124_v9  ;;  %v59_v46 = vld [vmem:[%s3707_s0 + $0x78] sm:$0xff]  ;;  %v58_v47 = vld [vmem:[%s3707_s0 + $0x70] sm:$0xff]  ;;  %v61_v48 = vld [vmem:[%s3707_s0 + $0x88] sm:$0xff] }
  0x11   :  { %283 = vmatprep.subr.mxu0 %v2532_v0  ;;  %v60_v49 = vld [vmem:[%s3707_s0 + $0x80] sm:$0xff]  ;;  %v63_v50 = vld [vmem:[%s3707_s0 + $0x98] sm:$0xff]  ;;  %v62_v51 = vld [vmem:[%s3707_s0 + $0x90] sm:$0xff] }
  0x12   :  { %284 = vmatpush1.msra.mxu0 %v123_v10  ;;  %v65_v52 = vld [vmem:[%s3707_s0 + $0xa8] sm:$0xff]  ;;  %v64_v53 = vld [vmem:[%s3707_s0 + $0xa0] sm:$0xff]  ;;  %v67_v54 = vld [vmem:[%s3707_s0 + $0xb8] sm:$0xff] }
  0x13   :  { %285 = vmatprep.subr.mxu0 %v2532_v0  ;;  %v66_v55 = vld [vmem:[%s3707_s0 + $0xb0] sm:$0xff]  ;;  %v69_v56 = vld [vmem:[%s3707_s0 + $0xc8] sm:$0xff]  ;;  %v68_v57 = vld [vmem:[%s3707_s0 + $0xc0] sm:$0xff] }
  0x14   :  { %286 = vmatpush1.msra.mxu0 %v122_v11  ;;  %v71_v58 = vld [vmem:[%s3707_s0 + $0xd8] sm:$0xff]  ;;  %v70_v59 = vld [vmem:[%s3707_s0 + $0xd0] sm:$0xff]  ;;  %v73_v60 = vld [vmem:[%s3707_s0 + $0xe8] sm:$0xff] }
  0x15   :  { %287 = vmatprep.subr.mxu0 %v2532_v0  ;;  %v72_v61 = vld [vmem:[%s3707_s0 + $0xe0] sm:$0xff]  ;;  %v75_v62 = vld [vmem:[%s3707_s0 + $0xf8] sm:$0xff]  ;;  %v74_v63 = vld [vmem:[%s3707_s0 + $0xf0] sm:$0xff] }
  0x16   :  { %288 = vmatpush1.msra.mxu0 %v121_v12  ;;  %v77_v1 = vld [vmem:[%s3707_s0 + $0x108] sm:$0xff]  ;;  %v76_v2 = vld [vmem:[%s3707_s0 + $0x100] sm:$0xff]  ;;  %v79_v3 = vld [vmem:[%s3707_s0 + $0x118] sm:$0xff] }
  0x17   :  { %289 = vmatprep.subr.mxu0 %v2532_v0  ;;  %v78_v4 = vld [vmem:[%s3707_s0 + $0x110] sm:$0xff]  ;;  %v81_v5 = vld [vmem:[%s3707_s0 + $0x128] sm:$0xff]  ;;  %v80_v6 = vld [vmem:[%s3707_s0 + $0x120] sm:$0xff] }
  0x18   :  { %290 = vmatpush1.msra.mxu0 %v120_v13  ;;  %v83_v7 = vld [vmem:[%s3707_s0 + $0x138] sm:$0xff]  ;;  %v82_v8 = vld [vmem:[%s3707_s0 + $0x130] sm:$0xff]  ;;  %v85_v9 = vld [vmem:[%s3707_s0 + $0x148] sm:$0xff] }
  0x19   :  { %291 = vmatprep.subr.mxu0 %v2532_v0  ;;  %v84_v10 = vld [vmem:[%s3707_s0 + $0x140] sm:$0xff]  ;;  %v87_v11 = vld [vmem:[%s3707_s0 + $0x158] sm:$0xff]  ;;  %v86_v12 = vld [vmem:[%s3707_s0 + $0x150] sm:$0xff] }
  0x1a   :  { %292 = vmatpush1.msra.mxu0 %v119_v14  ;;  %v89_v13 = vld [vmem:[%s3707_s0 + $0x168] sm:$0xff]  ;;  %v88_v14 = vld [vmem:[%s3707_s0 + $0x160] sm:$0xff] }
  0x1b   :  { %293 = vmatprep.subr.mxu0 %v2532_v0 }
  0x1c   :  { %294 = vmatpush1.msra.mxu0 %v118_v15  ;;  %v91_v15 = vld [vmem:[%s3707_s0 + $0x178] sm:$0xff] }
  0x1d   :  { %295 = vmatprep.subr.mxu0 %v2532_v0 }
  0x1e   :  { %296 = vmatpush1.msra.mxu0 %v117_v16  ;;  %v90_v16 = vld [vmem:[%s3707_s0 + $0x170] sm:$0xff] }
  0x1f   :  { %297 = vmatprep.subr.mxu0 %v2532_v0 }
  0x20   :  { %298 = vmatpush1.msra.mxu0 %v116_v17  ;;  %v93_v17 = vld [vmem:[%s3707_s0 + $0x188] sm:$0xff] }
  0x21   :  { %301 = vmatprep.subr.mxu0 %v2532_v0 }
  0x22   :  { %2231 = vmatpush2.msk.msra.mxu0 %vm263_vm1, %v146_v18  ;;  %v92_v18 = vld [vmem:[%s3707_s0 + $0x180] sm:$0xff] }
  0x23   :  { %303 = vmatprep.subr.mxu0 %v2532_v0 }
  0x24   :  { %304 = vmatpush2.msra.mxu0 %v145_v19  ;;  %v95_v19 = vld [vmem:[%s3707_s0 + $0x198] sm:$0xff] }
  0x25   :  { %305 = vmatprep.subr.mxu0 %v2532_v0 }
  0x26   :  { %306 = vmatpush2.msra.mxu0 %v144_v20  ;;  %v94_v20 = vld [vmem:[%s3707_s0 + $0x190] sm:$0xff] }
  0x27   :  { %307 = vmatprep.subr.mxu0 %v2532_v0 }
  0x28   :  { %308 = vmatpush2.msra.mxu0 %v143_v21  ;;  %v97_v21 = vld [vmem:[%s3707_s0 + $0x1a8] sm:$0xff] }
  0x29   :  { %309 = vmatprep.subr.mxu0 %v2532_v0 }
  0x2a   :  { %310 = vmatpush2.msra.mxu0 %v142_v22  ;;  %v96_v22 = vld [vmem:[%s3707_s0 + $0x1a0] sm:$0xff] }
  0x2b   :  { %311 = vmatprep.subr.mxu0 %v2532_v0 }
  0x2c   :  { %312 = vmatpush2.msra.mxu0 %v141_v23  ;;  %v551_v23 = vld [vmem:[%s3708_s4 + $0x18] sm:$0xff] }
  0x2d   :  { %313 = vmatprep.subr.mxu0 %v2532_v0  ;;  %2400 = vmatpush3.msra.mxu1 %v551_v23 }
  0x2e   :  { %314 = vmatpush2.msra.mxu0 %v140_v24  ;;  %v99_v24 = vld [vmem:[%s3707_s0 + $0x1b8] sm:$0xff]  ;;  %2401 = vmatprep.subr.mxu1 %v2532_v0 }
  0x2f   :  { %315 = vmatprep.subr.mxu0 %v2532_v0 }
  0x30   :  { %316 = vmatpush2.msra.mxu0 %v139_v25  ;;  %v550_v25 = vld [vmem:[%s3708_s4 + $0x10] sm:$0xff] }
  0x31   :  { %317 = vmatprep.subr.mxu0 %v2532_v0  ;;  %2402 = vmatpush3.msra.mxu1 %v550_v25 }
  0x32   :  { %318 = vmatpush2.msra.mxu0 %v138_v26  ;;  %v98_v26 = vld [vmem:[%s3707_s0 + $0x1b0] sm:$0xff]  ;;  %2430 = vmatprep.subr.mxu1 %v2532_v0 }
  0x33   :  { %319 = vmatprep.subr.mxu0 %v2532_v0 }
  0x34   :  { %320 = vmatpush2.msra.mxu0 %v137_v27  ;;  %v101_v27 = vld [vmem:[%s3707_s0 + $0x1c8] sm:$0xff] }
  0x35   :  { %321 = vmatprep.subr.mxu0 %v2532_v0 }
  0x36   :  { %322 = vmatpush2.msra.mxu0 %v136_v28  ;;  %v100_v28 = vld [vmem:[%s3707_s0 + $0x1c0] sm:$0xff] }
  0x37   :  { %323 = vmatprep.subr.mxu0 %v2532_v0 }
  0x38   :  { %324 = vmatpush2.msra.mxu0 %v135_v29  ;;  %v103_v29 = vld [vmem:[%s3707_s0 + $0x1d8] sm:$0xff] }
  0x39   :  { %325 = vmatprep.subr.mxu0 %v2532_v0 }
  0x3a   :  { %326 = vmatpush2.msra.mxu0 %v134_v30  ;;  %v102_v30 = vld [vmem:[%s3707_s0 + $0x1d0] sm:$0xff] }
  0x3b   :  { %327 = vmatprep.subr.mxu0 %v2532_v0 }
  0x3c   :  { %328 = vmatpush2.msra.mxu0 %v133_v31  ;;  %v105_v31 = vld [vmem:[%s3707_s0 + $0x1e8] sm:$0xff] }
  0x3d   :  { %329 = vmatprep.subr.mxu0 %v2532_v0 }
  0x3e   :  { %330 = vmatpush2.msra.mxu0 %v132_v32  ;;  %v104_v32 = vld [vmem:[%s3707_s0 + $0x1e0] sm:$0xff] }
  0x3f   :  { %332 = vmatmul.mubr.f32.vlgmr.msra.gmra.mxu0 %v44_v33  ;;  %v107_v33 = vld [vmem:[%s3707_s0 + $0x1f8] sm:$0xff] }
  0x40   :  { %2233 = vmatprep.mubr.msk.f32.mxu0 %vm154_vm0, %v47_v34  ;;  %v106_v34 = vld [vmem:[%s3707_s0 + $0x1f0] sm:$0xff] }
  0x43   :  { %337 = vmatmul.mubr.f32.gmra.mxu0 %v46_v35  ;;  %v109_v35 = vld [vmem:[%s3707_s0 + $0x208] sm:$0xff] }
  0x44   :  { %2234 = vmatprep.mubr.msk.f32.mxu0 %vm154_vm0, %v49_v36  ;;  %v108_v36 = vld [vmem:[%s3707_s0 + $0x200] sm:$0xff] }
  0x47   :  { %342 = vmatmul.mubr.f32.gmra.mxu0 %v48_v37  ;;  %v111_v37 = vld [vmem:[%s3707_s0 + $0x218] sm:$0xff] }
  0x48   :  { %2235 = vmatprep.mubr.msk.f32.mxu0 %vm154_vm0, %v51_v38  ;;  %v110_v38 = vld [vmem:[%s3707_s0 + $0x210] sm:$0xff] }
  0x4b   :  { %347 = vmatmul.mubr.f32.gmra.mxu0 %v50_v39  ;;  %v113_v39 = vld [vmem:[%s3707_s0 + $0x228] sm:$0xff] }
  0x4c   :  { %2236 = vmatprep.mubr.msk.f32.mxu0 %vm154_vm0, %v53_v40  ;;  %v112_v40 = vld [vmem:[%s3707_s0 + $0x220] sm:$0xff] }
  0x4f   :  { %352 = vmatmul.mubr.f32.gmra.mxu0 %v52_v41  ;;  %v115_v41 = vld [vmem:[%s3707_s0 + $0x238] sm:$0xff] }
  0x50   :  { %2237 = vmatprep.mubr.msk.f32.mxu0 %vm154_vm0, %v55_v42  ;;  %v114_v42 = vld [vmem:[%s3707_s0 + $0x230] sm:$0xff] }
  0x53   :  { %357 = vmatmul.mubr.f32.gmra.mxu0 %v54_v43 }
  0x54   :  { %2238 = vmatprep.mubr.msk.f32.mxu0 %vm154_vm0, %v57_v44 }
  0x57   :  { %362 = vmatmul.mubr.f32.gmra.mxu0 %v56_v45 }
  0x58   :  { %2239 = vmatprep.mubr.msk.f32.mxu0 %vm154_vm0, %v59_v46 }
  0x5b   :  { %367 = vmatmul.mubr.f32.gmra.mxu0 %v58_v47 }
  0x5c   :  { %2240 = vmatprep.mubr.msk.f32.mxu0 %vm154_vm0, %v61_v48 }
  0x5f   :  { %372 = vmatmul.mubr.f32.gmra.mxu0 %v60_v49 }
  0x60   :  { %2241 = vmatprep.mubr.msk.f32.mxu0 %vm154_vm0, %v63_v50 }
  0x63   :  { %377 = vmatmul.mubr.f32.gmra.mxu0 %v62_v51 }
  0x64   :  { %2242 = vmatprep.mubr.msk.f32.mxu0 %vm154_vm0, %v65_v52 }
  0x67   :  { %382 = vmatmul.mubr.f32.gmra.mxu0 %v64_v53 }
  0x68   :  { %2243 = vmatprep.mubr.msk.f32.mxu0 %vm154_vm0, %v67_v54 }
  0x6b   :  { %387 = vmatmul.mubr.f32.gmra.mxu0 %v66_v55 }
  0x6c   :  { %2244 = vmatprep.mubr.msk.f32.mxu0 %vm154_vm0, %v69_v56 }
  0x6f   :  { %392 = vmatmul.mubr.f32.gmra.mxu0 %v68_v57 }
  0x70   :  { %2245 = vmatprep.mubr.msk.f32.mxu0 %vm154_vm0, %v71_v58 }
  0x73   :  { %397 = vmatmul.mubr.f32.gmra.mxu0 %v70_v59 }
  0x74   :  { %2246 = vmatprep.mubr.msk.f32.mxu0 %vm154_vm0, %v73_v60 }
  0x77   :  { %402 = vmatmul.mubr.f32.gmra.mxu0 %v72_v61  ;;  %v3013_v61 = vld [vmem:[%s3709_s3] ss:$0 sm:$0xff] }
  0x78   :  { %2247 = vmatprep.mubr.msk.f32.mxu0 %vm154_vm0, %v75_v62 }
  0x7b   :  { %407 = vmatmul.mubr.f32.gmra.mxu0 %v74_v63 }
  0x7c   :  { %2248 = vmatprep.mubr.msk.f32.mxu0 %vm154_vm0, %v77_v1 }
  0x7f   :  { %412 = vmatmul.mubr.f32.gmra.mxu0 %v76_v2 }
  0x80   :  { %2249 = vmatprep.mubr.msk.f32.mxu0 %vm154_vm0, %v79_v3  ;;  %v549_v3 = vld [vmem:[%s3708_s4 + $0x8] sm:$0xff] }
  0x83   :  { %417 = vmatmul.mubr.f32.gmra.mxu0 %v78_v4 }
  0x84   :  { %2250 = vmatprep.mubr.msk.f32.mxu0 %vm154_vm0, %v81_v5 }
  0x87   :  { %422 = vmatmul.mubr.f32.gmra.mxu0 %v80_v6  ;;  %v548_v6 = vld [vmem:[%s3708_s4] sm:$0xff] }
  0x88   :  { %2251 = vmatprep.mubr.msk.f32.mxu0 %vm154_vm0, %v83_v7 }
  0x8b   :  { %427 = vmatmul.mubr.f32.gmra.mxu0 %v82_v8 }
  0x8c   :  { %2252 = vmatprep.mubr.msk.f32.mxu0 %vm154_vm0, %v85_v9 }
  0x8f   :  { %432 = vmatmul.mubr.f32.gmra.mxu0 %v84_v10 }
  0x90   :  { %2253 = vmatprep.mubr.msk.f32.mxu0 %vm154_vm0, %v87_v11 }
  0x93   :  { %437 = vmatmul.mubr.f32.gmra.mxu0 %v86_v12 }
  0x94   :  { %2254 = vmatprep.mubr.msk.f32.mxu0 %vm154_vm0, %v89_v13 }
  0x97   :  { %442 = vmatmul.mubr.f32.gmra.mxu0 %v88_v14 }
  0x98   :  { %2255 = vmatprep.mubr.msk.f32.mxu0 %vm154_vm0, %v91_v15 }
  0x9b   :  { %447 = vmatmul.mubr.f32.gmra.mxu0 %v90_v16 }
  0x9c   :  { %2256 = vmatprep.mubr.msk.f32.mxu0 %vm154_vm0, %v93_v17 }
  0x9f   :  { %452 = vmatmul.mubr.f32.gmra.mxu0 %v92_v18 }
  0xa0   :  { %2257 = vmatprep.mubr.msk.f32.mxu0 %vm154_vm0, %v95_v19 }
  0xa3   :  { %457 = vmatmul.mubr.f32.gmra.mxu0 %v94_v20 }
  0xa4   :  { %2258 = vmatprep.mubr.msk.f32.mxu0 %vm154_vm0, %v97_v21 }
  0xa7   :  { %462 = vmatmul.mubr.f32.gmra.mxu0 %v96_v22 }
  0xa8   :  { %2259 = vmatprep.mubr.msk.f32.mxu0 %vm154_vm0, %v99_v24 }
  0xab   :  { %467 = vmatmul.mubr.f32.gmra.mxu0 %v98_v26 }
  0xac   :  { %2260 = vmatprep.mubr.msk.f32.mxu0 %vm154_vm0, %v101_v27 }
  0xaf   :  { %472 = vmatmul.mubr.f32.gmra.mxu0 %v100_v28 }
  0xb0   :  { %2261 = vmatprep.mubr.msk.f32.mxu0 %vm154_vm0, %v103_v29 }
  0xb3   :  { %477 = vmatmul.mubr.f32.gmra.mxu0 %v102_v30 }
  0xb4   :  { %2262 = vmatprep.mubr.msk.f32.mxu0 %vm154_vm0, %v105_v31 }
  0xb7   :  { %482 = vmatmul.mubr.f32.gmra.mxu0 %v104_v32 }
  0xb8   :  { %2263 = vmatprep.mubr.msk.f32.mxu0 %vm154_vm0, %v107_v33 }
  0xbb   :  { %487 = vmatmul.mubr.f32.gmra.mxu0 %v106_v34 }
  0xbc   :  { %2264 = vmatprep.mubr.msk.f32.mxu0 %vm154_vm0, %v109_v35 }
  0xbf   :  { %492 = vmatmul.mubr.f32.gmra.mxu0 %v108_v36 }
  0xc0   :  { %2265 = vmatprep.mubr.msk.f32.mxu0 %vm154_vm0, %v111_v37 }
  0xc3   :  { %497 = vmatmul.mubr.f32.gmra.mxu0 %v110_v38 }
  0xc4   :  { %2266 = vmatprep.mubr.msk.f32.mxu0 %vm154_vm0, %v113_v39 }
  0xc7   :  { %502 = vmatmul.mubr.f32.gmra.mxu0 %v112_v40 }
  0xc8   :  { %2267 = vmatprep.mubr.msk.f32.mxu0 %vm154_vm0, %v115_v41 }
  0xcb   :  { %507 = vmatmul.mubr.f32.gmra.mxu0 %v114_v42  ;;  %v553_v42 = vld [vmem:[%s3708_s4 + $0x28] sm:$0xff] }
  0xcc   :  { %1892 = vmatprep.mubr.f32.mxu0 %v2532_v0 }
  0xff   :  { %v2992_v43 = vpop.f32.mrf.mxu0 }
 0x100   :  { %v334_v36 = vadd.f32 %v3013_v61, %v2992_v43  ;;  %v552_v43 = vld [vmem:[%s3708_s4 + $0x20] sm:$0xff] }
 0x101   :  { %v335_v44 = vpop.f32.mrf.mxu0 }
 0x102   :  { %v512_v40 = vmax.f32 %v334_v36, 0.0 }
 0x103   :  { %v2994_v45 = vpop.f32.mrf.mxu0 }
 0x104   :  { %v339_v41 = vadd.f32 %v3013_v61, %v2994_v45 }
 0x105   :  { %v340_v46 = vpop.f32.mrf.mxu0 }
 0x107   :  { %v2996_v47 = vpop.f32.mrf.mxu0 }
 0x108   :  { %v344_v45 = vadd.f32 %v3013_v61, %v2996_v47 }
 0x109   :  { %v345_v48 = vpop.f32.mrf.mxu0 }
 0x10a   :  { %v513_v48 = vmax.f32 %v339_v41, 0.0 }
 0x10b   :  { %v2998_v49 = vpop.f32.mrf.mxu0 }
 0x10d   :  { %v350_v50 = vpop.f32.mrf.mxu0 }
 0x10f   :  { %v3000_v51 = vpop.f32.mrf.mxu0 }
 0x111   :  { %v355_v52 = vpop.f32.mrf.mxu0 }
 0x113   :  { %v3002_v53 = vpop.f32.mrf.mxu0 }
 0x115   :  { %v360_v54 = vpop.f32.mrf.mxu0 }
 0x116   :  { %v514_v54 = vmax.f32 %v344_v45, 0.0 }
 0x117   :  { %v3004_v55 = vpop.f32.mrf.mxu0 }
 0x119   :  { %v365_v56 = vpop.f32.mrf.mxu0 }
 0x11a   :  { %v349_v56 = vadd.f32 %v3013_v61, %v2998_v49  ;;  %v359_v49 = vadd.f32 %v3013_v61, %v3002_v53 }
 0x11b   :  { %v3006_v57 = vpop.f32.mrf.mxu0 }
 0x11c   :  { %v369_v53 = vadd.f32 %v3013_v61, %v3006_v57 }
 0x11d   :  { %v370_v58 = vpop.f32.mrf.mxu0 }
 0x11f   :  { %v3008_v59 = vpop.f32.mrf.mxu0 }
 0x121   :  { %v375_v60 = vpop.f32.mrf.mxu0 }
 0x122   :  { %v515_v60 = vmax.f32 %v349_v56, 0.0 }
 0x123   :  { %v378_v62 = vpop.f32.mrf.mxu0 }
 0x124   :  { %v379_v63 = vadd.f32 %v3013_v61, %v378_v62  ;;  %v354_v62 = vadd.f32 %v3013_v61, %v3000_v51  ;;  %v364_v51 = vadd.f32 %v3013_v61, %v3004_v55  ;;  %v374_v55 = vadd.f32 %v3013_v61, %v3008_v59 }
 0x125   :  { %v380_v1 = vpop.f32.mrf.mxu0 }
 0x126   :  { %v521_v2 = vmax.f32 %v379_v63, 0.0 }
 0x127   :  { %v383_v4 = vpop.f32.mrf.mxu0 }
 0x128   :  { %v384_v5 = vadd.f32 %v3013_v61, %v383_v4  ;;  %2404 = vmatmul.mubr.msk.f32.vlgmr.msra.gmra.mxu1 %vm556_vm3, %v521_v2  ;;  %v516_v2 = vmax.f32 %v354_v62, 0.0 }
 0x129   :  { %2431 = vmatpush3.msra.mxu1 %v549_v3  ;;  %v385_v7 = vpop.f32.mrf.mxu0  ;;  %2406 = vmatprep.mubr.msk.f32.mxu1 %vm2533_vm2, %v2532_v0 }
 0x12a   :  { %v522_v8 = vmax.f32 %v384_v5, 0.0  ;;  %2432 = vmatprep.subr.mxu1 %v2532_v0  ;;  %v517_v5 = vmax.f32 %v359_v49, 0.0 }
 0x12b   :  { %v388_v9 = vpop.f32.mrf.mxu0  ;;  %2433 = vmatpush3.msra.mxu1 %v548_v6 }
 0x12c   :  { %v389_v10 = vadd.f32 %v3013_v61, %v388_v9  ;;  %2407 = vmatmul.mubr.msk.f32.gmra.mxu1 %vm556_vm3, %v522_v8  ;;  %2461 = vmatprep.subr.mxu1 %v2532_v0  ;;  %v518_v8 = vmax.f32 %v364_v51, 0.0 }
 0x12d   :  { %v390_v11 = vpop.f32.mrf.mxu0  ;;  %2409 = vmatprep.mubr.msk.f32.mxu1 %vm2533_vm2, %v2532_v0 }
 0x12e   :  { %v523_v12 = vmax.f32 %v389_v10, 0.0  ;;  %v519_v11 = vmax.f32 %v369_v53, 0.0 }
 0x12f   :  { %v393_v13 = vpop.f32.mrf.mxu0 }
 0x130   :  { %v394_v14 = vadd.f32 %v3013_v61, %v393_v13  ;;  %2410 = vmatmul.mubr.msk.f32.gmra.mxu1 %vm556_vm3, %v523_v12 }
 0x131   :  { %v395_v15 = vpop.f32.mrf.mxu0  ;;  %2412 = vmatprep.mubr.msk.f32.mxu1 %vm2533_vm2, %v2532_v0 }
 0x132   :  { %v524_v16 = vmax.f32 %v394_v14, 0.0  ;;  %v520_v14 = vmax.f32 %v374_v55, 0.0  ;;  %v1216_v55 = vld [vmem:[%s3710_s6 + $0x220] sm:$0xff] }
 0x133   :  { %v398_v17 = vpop.f32.mrf.mxu0 }
 0x134   :  { %v399_v18 = vadd.f32 %v3013_v61, %v398_v17  ;;  %2413 = vmatmul.mubr.msk.f32.gmra.mxu1 %vm556_vm3, %v524_v16 }
 0x135   :  { %v400_v19 = vpop.f32.mrf.mxu0  ;;  %2415 = vmatprep.mubr.msk.f32.mxu1 %vm2533_vm2, %v2532_v0 }
 0x136   :  { %v525_v20 = vmax.f32 %v399_v18, 0.0  ;;  %v555_v18 = vld [vmem:[%s3708_s4 + $0x38] sm:$0xff] }
 0x137   :  { %v403_v21 = vpop.f32.mrf.mxu0 }
 0x138   :  { %v404_v22 = vadd.f32 %v3013_v61, %v403_v21  ;;  %2416 = vmatmul.mubr.msk.f32.gmra.mxu1 %vm556_vm3, %v525_v20 }
 0x139   :  { %v405_v23 = vpop.f32.mrf.mxu0  ;;  %2418 = vmatprep.mubr.msk.f32.mxu1 %vm2533_vm2, %v2532_v0 }
 0x13a   :  { %v526_v24 = vmax.f32 %v404_v22, 0.0  ;;  %v554_v22 = vld [vmem:[%s3708_s4 + $0x30] sm:$0xff] }
 0x13b   :  { %v408_v25 = vpop.f32.mrf.mxu0 }
 0x13c   :  { %v409_v26 = vadd.f32 %v3013_v61, %v408_v25  ;;  %2419 = vmatmul.mubr.msk.f32.gmra.mxu1 %vm556_vm3, %v526_v24 }
 0x13d   :  { %v410_v27 = vpop.f32.mrf.mxu0  ;;  %2421 = vmatprep.mubr.msk.f32.mxu1 %vm2533_vm2, %v2532_v0 }
 0x13e   :  { %v527_v28 = vmax.f32 %v409_v26, 0.0 }
 0x13f   :  { %v413_v29 = vpop.f32.mrf.mxu0 }
 0x140   :  { %v414_v30 = vadd.f32 %v3013_v61, %v413_v29  ;;  %2422 = vmatmul.mubr.msk.f32.gmra.mxu1 %vm556_vm3, %v527_v28 }
 0x141   :  { %v415_v31 = vpop.f32.mrf.mxu0  ;;  %2424 = vmatprep.mubr.msk.f32.mxu1 %vm2533_vm2, %v2532_v0 }
 0x142   :  { %v528_v32 = vmax.f32 %v414_v30, 0.0 }
 0x143   :  { %v418_v33 = vpop.f32.mrf.mxu0 }
 0x144   :  { %v419_v34 = vadd.f32 %v3013_v61, %v418_v33  ;;  %2425 = vmatmul.mubr.msk.f32.gmra.mxu1 %vm556_vm3, %v528_v32 }
 0x145   :  { %v420_v35 = vpop.f32.mrf.mxu0  ;;  %2427 = vmatprep.mubr.msk.f32.mxu1 %vm2533_vm2, %v2532_v0 }
 0x146   :  { %v529_v37 = vmax.f32 %v419_v34, 0.0 }
 0x147   :  { %v423_v38 = vpop.f32.mrf.mxu0 }
 0x148   :  { %2428 = vmatmul.mubr.msk.f32.gmra.mxu1 %vm556_vm3, %v529_v37  ;;  %v424_v13 = vadd.f32 %v3013_v61, %v423_v38 }
 0x149   :  { %2434 = vmatprep.mubr.msk.f32.mxu1 %vm2533_vm2, %v2532_v0  ;;  %v425_v39 = vpop.f32.mrf.mxu0 }
 0x14a   :  { %v530_v16 = vmax.f32 %v424_v13, 0.0  ;;  %v1162_v13 = vld [vmem:[%s3710_s6 + $0x70] sm:$0xff] }
 0x14b   :  { %v428_v44 = vpop.f32.mrf.mxu0 }
 0x14c   :  { %2435 = vmatmul.mubr.msk.f32.vlgmr.msra.gmra.mxu1 %vm556_vm3, %v512_v40  ;;  %v429_v17 = vadd.f32 %v3013_v61, %v428_v44 }
 0x14d   :  { %2462 = vmatpush3.msra.mxu1 %v553_v42  ;;  %2437 = vmatprep.mubr.msk.f32.mxu1 %vm2533_vm2, %v2532_v0  ;;  %v430_v46 = vpop.f32.mrf.mxu0 }
 0x14e   :  { %2463 = vmatprep.subr.mxu1 %v2532_v0  ;;  %v531_v20 = vmax.f32 %v429_v17, 0.0  ;;  %v1219_v46 = vld [vmem:[%s3710_s6 + $0x238] sm:$0xff] }
 0x14f   :  { %2464 = vmatpush3.msra.mxu1 %v552_v43  ;;  %v433_v50 = vpop.f32.mrf.mxu0  ;;  %1852 = vmatprep.subr.mxu0 %v1219_v46  ;;  %v1215_v17 = vld [vmem:[%s3710_s6 + $0x218] sm:$0xff] }
 0x150   :  { %2438 = vmatmul.mubr.msk.f32.gmra.mxu1 %vm556_vm3, %v513_v48  ;;  %2492 = vmatprep.subr.mxu1 %v2532_v0  ;;  %v434_v21 = vadd.f32 %v3013_v61, %v433_v50  ;;  %v1218_v50 = vld [vmem:[%s3710_s6 + $0x230] sm:$0xff] }
 0x151   :  { %2440 = vmatprep.mubr.msk.f32.mxu1 %vm2533_vm2, %v2532_v0  ;;  %v435_v52 = vpop.f32.mrf.mxu0  ;;  %1853 = vmatpush1.msra.mxu0 %v1218_v50 }
 0x152   :  { %v532_v25 = vmax.f32 %v434_v21, 0.0 }
 0x153   :  { %v438_v58 = vpop.f32.mrf.mxu0 }
 0x154   :  { %2441 = vmatmul.mubr.msk.f32.gmra.mxu1 %vm556_vm3, %v514_v54  ;;  %v439_v26 = vadd.f32 %v3013_v61, %v438_v58 }
 0x155   :  { %2443 = vmatprep.mubr.msk.f32.mxu1 %vm2533_vm2, %v2532_v0  ;;  %v440_v47 = vpop.f32.mrf.mxu0 }
 0x156   :  { %v533_v29 = vmax.f32 %v439_v26, 0.0 }
 0x157   :  { %v443_v63 = vpop.f32.mrf.mxu0 }
 0x158   :  { %2444 = vmatmul.mubr.msk.f32.gmra.mxu1 %vm556_vm3, %v515_v60  ;;  %v444_v30 = vadd.f32 %v3013_v61, %v443_v63 }
 0x159   :  { %2446 = vmatprep.mubr.msk.f32.mxu1 %vm2533_vm2, %v2532_v0  ;;  %v445_v1 = vpop.f32.mrf.mxu0 }
 0x15a   :  { %v534_v33 = vmax.f32 %v444_v30, 0.0 }
 0x15b   :  { %v448_v3 = vpop.f32.mrf.mxu0 }
 0x15c   :  { %2447 = vmatmul.mubr.msk.f32.gmra.mxu1 %vm556_vm3, %v516_v2  ;;  %v449_v34 = vadd.f32 %v3013_v61, %v448_v3 }
 0x15d   :  { %2449 = vmatprep.mubr.msk.f32.mxu1 %vm2533_vm2, %v2532_v0  ;;  %v450_v4 = vpop.f32.mrf.mxu0 }
 0x15e   :  { %v535_v37 = vmax.f32 %v449_v34, 0.0 }
 0x15f   :  { %v453_v6 = vpop.f32.mrf.mxu0 }
 0x160   :  { %2450 = vmatmul.mubr.msk.f32.gmra.mxu1 %vm556_vm3, %v517_v5  ;;  %v454_v38 = vadd.f32 %v3013_v61, %v453_v6 }
 0x161   :  { %2452 = vmatprep.mubr.msk.f32.mxu1 %vm2533_vm2, %v2532_v0  ;;  %v455_v7 = vpop.f32.mrf.mxu0 }
 0x162   :  { %v536_v41 = vmax.f32 %v454_v38, 0.0 }
 0x163   :  { %v458_v9 = vpop.f32.mrf.mxu0 }
 0x164   :  { %2453 = vmatmul.mubr.msk.f32.gmra.mxu1 %vm556_vm3, %v518_v8  ;;  %v459_v42 = vadd.f32 %v3013_v61, %v458_v9  ;;  %v1217_v9 = vld [vmem:[%s3710_s6 + $0x228] sm:$0xff] }
 0x165   :  { %2455 = vmatprep.mubr.msk.f32.mxu1 %vm2533_vm2, %v2532_v0  ;;  %v460_v10 = vpop.f32.mrf.mxu0  ;;  %1854 = vmatprep.subr.mxu0 %v1217_v9 }
 0x166   :  { %v537_v48 = vmax.f32 %v459_v42, 0.0  ;;  %1855 = vmatpush1.msra.mxu0 %v1216_v55 }
 0x167   :  { %v463_v12 = vpop.f32.mrf.mxu0  ;;  %1856 = vmatprep.subr.mxu0 %v1215_v17 }
 0x168   :  { %2456 = vmatmul.mubr.msk.f32.gmra.mxu1 %vm556_vm3, %v519_v11  ;;  %v464_v45 = vadd.f32 %v3013_v61, %v463_v12 }
 0x169   :  { %2458 = vmatprep.mubr.msk.f32.mxu1 %vm2533_vm2, %v2532_v0  ;;  %v465_v57 = vpop.f32.mrf.mxu0 }
 0x16a   :  { %v538_v56 = vmax.f32 %v464_v45, 0.0  ;;  %v1161_v57 = vld [vmem:[%s3710_s6 + $0x68] sm:$0xff] }
 0x16b   :  { %v468_v15 = vpop.f32.mrf.mxu0 }
 0x16c   :  { %2459 = vmatmul.mubr.msk.f32.gmra.mxu1 %vm556_vm3, %v520_v14  ;;  %v469_v58 = vadd.f32 %v3013_v61, %v468_v15  ;;  %v1160_v14 = vld [vmem:[%s3710_s6 + $0x60] sm:$0xff]  ;;  %v1159_v15 = vld [vmem:[%s3710_s6 + $0x58] sm:$0xff] }
 0x16d   :  { %2465 = vmatprep.mubr.msk.f32.mxu1 %vm2533_vm2, %v2532_v0  ;;  %v470_v59 = vpop.f32.mrf.mxu0 }
 0x16e   :  { %v539_v60 = vmax.f32 %v469_v58, 0.0  ;;  %v1214_v59 = vld [vmem:[%s3710_s6 + $0x210] sm:$0xff] }
 0x16f   :  { %v473_v19 = vpop.f32.mrf.mxu0  ;;  %1857 = vmatpush1.msra.mxu0 %v1214_v59 }
 0x170   :  { %2466 = vmatmul.mubr.msk.f32.vlgmr.msra.gmra.mxu1 %vm556_vm3, %v530_v16  ;;  %v474_v62 = vadd.f32 %v3013_v61, %v473_v19  ;;  %v1158_v16 = vld [vmem:[%s3710_s6 + $0x50] sm:$0xff]  ;;  %v1156_v19 = vld [vmem:[%s3710_s6 + $0x40] sm:$0xff] }
 0x171   :  { %2493 = vmatpush3.msra.mxu1 %v555_v18  ;;  %2468 = vmatprep.mubr.msk.f32.mxu1 %vm2533_vm2, %v2532_v0  ;;  %v475_v23 = vpop.f32.mrf.mxu0  ;;  %v1157_v18 = vld [vmem:[%s3710_s6 + $0x48] sm:$0xff] }
 0x172   :  { %2494 = vmatprep.subr.mxu1 %v2532_v0  ;;  %v540_v63 = vmax.f32 %v474_v62, 0.0 }
 0x173   :  { %2495 = vmatpush3.msra.mxu1 %v554_v22  ;;  %v478_v24 = vpop.f32.mrf.mxu0 }
 0x174   :  { %2469 = vmatmul.mubr.msk.f32.gmra.mxu1 %vm556_vm3, %v531_v20  ;;  %v479_v1 = vadd.f32 %v3013_v61, %v478_v24  ;;  %v1155_v20 = vld [vmem:[%s3710_s6 + $0x38] sm:$0xff] }
 0x175   :  { %2471 = vmatprep.mubr.msk.f32.mxu1 %vm2533_vm2, %v2532_v0  ;;  %v480_v27 = vpop.f32.mrf.mxu0 }
 0x176   :  { %v541_v2 = vmax.f32 %v479_v1, 0.0 }
 0x177   :  { %v483_v28 = vpop.f32.mrf.mxu0 }
 0x178   :  { %2472 = vmatmul.mubr.msk.f32.gmra.mxu1 %vm556_vm3, %v532_v25  ;;  %v484_v49 = vadd.f32 %v3013_v61, %v483_v28  ;;  %v1213_v28 = vld [vmem:[%s3710_s6 + $0x208] sm:$0xff] }
 0x179   :  { %2474 = vmatprep.mubr.msk.f32.mxu1 %vm2533_vm2, %v2532_v0  ;;  %v485_v31 = vpop.f32.mrf.mxu0  ;;  %1858 = vmatprep.subr.mxu0 %v1213_v28 }
 0x17a   :  { %v542_v3 = vmax.f32 %v484_v49, 0.0  ;;  %v1212_v31 = vld [vmem:[%s3710_s6 + $0x200] sm:$0xff] }
 0x17b   :  { %v488_v32 = vpop.f32.mrf.mxu0  ;;  %1859 = vmatpush1.msra.mxu0 %v1212_v31 }
 0x17c   :  { %2475 = vmatmul.mubr.msk.f32.gmra.mxu1 %vm556_vm3, %v533_v29  ;;  %v489_v4 = vadd.f32 %v3013_v61, %v488_v32 }
 0x17d   :  { %2477 = vmatprep.mubr.msk.f32.mxu1 %vm2533_vm2, %v2532_v0  ;;  %v490_v35 = vpop.f32.mrf.mxu0 }
 0x17e   :  { %v543_v5 = vmax.f32 %v489_v4, 0.0 }
 0x17f   :  { %v493_v36 = vpop.f32.mrf.mxu0 }
 0x180   :  { %2478 = vmatmul.mubr.msk.f32.gmra.mxu1 %vm556_vm3, %v534_v33  ;;  %v494_v51 = vadd.f32 %v3013_v61, %v493_v36 }
 0x181   :  { %2480 = vmatprep.mubr.msk.f32.mxu1 %vm2533_vm2, %v2532_v0  ;;  %v495_v39 = vpop.f32.mrf.mxu0 }
 0x182   :  { %v544_v6 = vmax.f32 %v494_v51, 0.0 }
 0x183   :  { %v498_v40 = vpop.f32.mrf.mxu0 }
 0x184   :  { %2481 = vmatmul.mubr.msk.f32.gmra.mxu1 %vm556_vm3, %v535_v37  ;;  %v499_v7 = vadd.f32 %v3013_v61, %v498_v40 }
 0x185   :  { %2483 = vmatprep.mubr.msk.f32.mxu1 %vm2533_vm2, %v2532_v0  ;;  %v500_v44 = vpop.f32.mrf.mxu0 }
 0x186   :  { %v545_v8 = vmax.f32 %v499_v7, 0.0 }
 0x187   :  { %v503_v43 = vpop.f32.mrf.mxu0 }
 0x188   :  { %2484 = vmatmul.mubr.msk.f32.gmra.mxu1 %vm556_vm3, %v536_v41  ;;  %v504_v53 = vadd.f32 %v3013_v61, %v503_v43 }
 0x189   :  { %2486 = vmatprep.mubr.msk.f32.mxu1 %vm2533_vm2, %v2532_v0  ;;  %v505_v52 = vpop.f32.mrf.mxu0 }
 0x18a   :  { %v546_v10 = vmax.f32 %v504_v53, 0.0 }
 0x18b   :  { %v508_v54 = vpop.f32.mrf.mxu0 }
 0x18c   :  { %2487 = vmatmul.mubr.msk.f32.gmra.mxu1 %vm556_vm3, %v537_v48  ;;  %v509_v11 = vadd.f32 %v3013_v61, %v508_v54  ;;  %v1163_v61 = vld [vmem:[%s3710_s6 + $0x78] sm:$0xff] }
 0x18d   :  { %2489 = vmatprep.mubr.msk.f32.mxu1 %vm2533_vm2, %v2532_v0  ;;  %v510_v47 = vpop.f32.mrf.mxu0  ;;  %1248 = vmatprep.subr.mxu1 %v1163_v61 }
 0x18e   :  { %v547_v12 = vmax.f32 %v509_v11, 0.0 }
 0x190   :  { %2490 = vmatmul.mubr.msk.f32.gmra.mxu1 %vm556_vm3, %v538_v56 }
 0x191   :  { %2496 = vmatprep.mubr.msk.f32.mxu1 %vm2533_vm2, %v2532_v0 }
 0x194   :  { %2497 = vmatmul.mubr.msk.f32.vlgmr.msra.gmra.mxu1 %vm556_vm3, %v539_v60 }
 0x195   :  { %2499 = vmatprep.mubr.msk.f32.mxu1 %vm2533_vm2, %v2532_v0  ;;  %1249 = vmatpush1.msra.mxu1 %v1162_v13 }
 0x196   :  { %1250 = vmatprep.subr.mxu1 %v1161_v57 }
 0x197   :  { %1251 = vmatpush1.msra.mxu1 %v1160_v14 }
 0x198   :  { %2500 = vmatmul.mubr.msk.f32.gmra.mxu1 %vm556_vm3, %v540_v63  ;;  %1252 = vmatprep.subr.mxu1 %v1159_v15 }
 0x199   :  { %2502 = vmatprep.mubr.msk.f32.mxu1 %vm2533_vm2, %v2532_v0  ;;  %1253 = vmatpush1.msra.mxu1 %v1158_v16 }
 0x19a   :  { %1254 = vmatprep.subr.mxu1 %v1157_v18 }
 0x19b   :  { %1255 = vmatpush1.msra.mxu1 %v1156_v19 }
 0x19c   :  { %2503 = vmatmul.mubr.msk.f32.gmra.mxu1 %vm556_vm3, %v541_v2  ;;  %1322 = vmatprep.subr.mxu1 %v1155_v20 }
 0x19d   :  { %2505 = vmatprep.mubr.msk.f32.mxu1 %vm2533_vm2, %v2532_v0 }
 0x1a0   :  { %2506 = vmatmul.mubr.msk.f32.gmra.mxu1 %vm556_vm3, %v542_v3 }
 0x1a1   :  { %2508 = vmatprep.mubr.msk.f32.mxu1 %vm2533_vm2, %v2532_v0 }
 0x1a4   :  { %2509 = vmatmul.mubr.msk.f32.gmra.mxu1 %vm556_vm3, %v543_v5 }
 0x1a5   :  { %2511 = vmatprep.mubr.msk.f32.mxu1 %vm2533_vm2, %v2532_v0 }
 0x1a8   :  { %2512 = vmatmul.mubr.msk.f32.gmra.mxu1 %vm556_vm3, %v544_v6 }
 0x1a9   :  { %2514 = vmatprep.mubr.msk.f32.mxu1 %vm2533_vm2, %v2532_v0 }
 0x1ac   :  { %2515 = vmatmul.mubr.msk.f32.gmra.mxu1 %vm556_vm3, %v545_v8 }
 0x1ad   :  { %2517 = vmatprep.mubr.msk.f32.mxu1 %vm2533_vm2, %v2532_v0 }
 0x1b0   :  { %2518 = vmatmul.mubr.msk.f32.gmra.mxu1 %vm556_vm3, %v546_v10 }
 0x1b1   :  { %2520 = vmatprep.mubr.msk.f32.mxu1 %vm2533_vm2, %v2532_v0 }
 0x1b4   :  { %2521 = vmatmul.mubr.msk.f32.gmra.mxu1 %vm556_vm3, %v547_v12 }
 0x1b5   :  { %1288 = vmatprep.mubr.f32.mxu1 %v2532_v0 }
 0x1e8   :  { %v650_v21 = vpop.f32.mrf.mxu1 }
 0x1ea   :  { %v2405_v22 = vpop.f32.mrf.mxu1 }
 0x1ec   :  { %v655_v23 = vpop.f32.mrf.mxu1 }
 0x1ee   :  { %v2408_v24 = vpop.f32.mrf.mxu1 }
 0x1f0   :  { %v660_v25 = vpop.f32.mrf.mxu1 }
 0x1f2   :  { %v2411_v26 = vpop.f32.mrf.mxu1 }
 0x1f4   :  { %v665_v27 = vpop.f32.mrf.mxu1 }
 0x1f6   :  { %v2414_v29 = vpop.f32.mrf.mxu1 }
 0x1f7   :  { %v3268_v29 = vld [vmem:[%s3711_s5] ss:$0 sm:$0xff] }
 0x1f8   :  { %v670_v30 = vpop.f32.mrf.mxu1 }
 0x1fa   :  { %v2417_v32 = vpop.f32.mrf.mxu1 }
 0x1fc   :  { %v675_v33 = vpop.f32.mrf.mxu1 }
 0x1fe   :  { %v2420_v34 = vpop.f32.mrf.mxu1 }
 0x200   :  { %v680_v35 = vpop.f32.mrf.mxu1 }
 0x202   :  { %v2423_v36 = vpop.f32.mrf.mxu1 }
 0x203   :  { %v1154_v36 = vld [vmem:[%s3710_s6 + $0x30] sm:$0xff] }
 0x204   :  { %v685_v37 = vpop.f32.mrf.mxu1 }
 0x206   :  { %v2426_v38 = vpop.f32.mrf.mxu1 }
 0x207   :  { %v1153_v38 = vld [vmem:[%s3710_s6 + $0x28] sm:$0xff] }
 0x208   :  { %v690_v39 = vpop.f32.mrf.mxu1 }
 0x20a   :  { %v2429_v40 = vpop.f32.mrf.mxu1 }
 0x20c   :  { %v787_v41 = vpop.f32.mrf.mxu1 }
 0x20d   :  { %v788_v42 = vadd.f32 %v787_v41, %v650_v21  ;;  %v1151_v41 = vld [vmem:[%s3710_s6 + $0x18] sm:$0xff] }
 0x20e   :  { %v2436_v44 = vpop.f32.mrf.mxu1 }
 0x20f   :  { %v1150_v44 = vld [vmem:[%s3710_s6 + $0x10] sm:$0xff] }
 0x210   :  { %v792_v43 = vpop.f32.mrf.mxu1 }
 0x211   :  { %v793_v46 = vadd.f32 %v792_v43, %v655_v23 }
 0x212   :  { %v2439_v48 = vpop.f32.mrf.mxu1 }
 0x214   :  { %v797_v45 = vpop.f32.mrf.mxu1 }
 0x215   :  { %v3241_v50 = vadd.f32 %v797_v45, %v660_v25  ;;  %v1148_v45 = vld [vmem:[%s3710_s6] sm:$0xff] }
 0x216   :  { %v2442_v52 = vpop.f32.mrf.mxu1 }
 0x218   :  { %v802_v54 = vpop.f32.mrf.mxu1 }
 0x219   :  { %v3243_v56 = vadd.f32 %v802_v54, %v665_v27  ;;  %v1171_v54 = vld [vmem:[%s3710_s6 + $0xb8] sm:$0xff] }
 0x21a   :  { %v2445_v58 = vpop.f32.mrf.mxu1 }
 0x21c   :  { %v807_v47 = vpop.f32.mrf.mxu1 }
 0x21d   :  { %v3245_v60 = vadd.f32 %v807_v47, %v670_v30 }
 0x21e   :  { %v2448_v62 = vpop.f32.mrf.mxu1 }
 0x21f   :  { %v1170_v62 = vld [vmem:[%s3710_s6 + $0xb0] sm:$0xff] }
 0x220   :  { %v812_v63 = vpop.f32.mrf.mxu1 }
 0x221   :  { %v3247_v1 = vadd.f32 %v812_v63, %v675_v33  ;;  %v1169_v63 = vld [vmem:[%s3710_s6 + $0xa8] sm:$0xff] }
 0x222   :  { %v2451_v2 = vpop.f32.mrf.mxu1 }
 0x223   :  { %v1168_v2 = vld [vmem:[%s3710_s6 + $0xa0] sm:$0xff] }
 0x224   :  { %v817_v49 = vpop.f32.mrf.mxu1 }
 0x225   :  { %v3249_v3 = vadd.f32 %v817_v49, %v680_v35 }
 0x226   :  { %v2454_v4 = vpop.f32.mrf.mxu1 }
 0x227   :  { %v1167_v4 = vld [vmem:[%s3710_s6 + $0x98] sm:$0xff] }
 0x228   :  { %v822_v5 = vpop.f32.mrf.mxu1 }
 0x229   :  { %v823_v51 = vadd.f32 %v822_v5, %v685_v37 }
 0x22a   :  { %v2457_v6 = vpop.f32.mrf.mxu1 }
 0x22c   :  { %v827_v7 = vpop.f32.mrf.mxu1 }
 0x22d   :  { %v3251_v8 = vadd.f32 %v827_v7, %v690_v39  ;;  %v1152_v39 = vld [vmem:[%s3710_s6 + $0x20] sm:$0xff]  ;;  %v1165_v7 = vld [vmem:[%s3710_s6 + $0x88] sm:$0xff] }
 0x22e   :  { %v2460_v53 = vpop.f32.mrf.mxu1 }
 0x230   :  { %v924_v9 = vpop.f32.mrf.mxu1 }
 0x231   :  { %v968_v31 = vadd.f32 %v924_v9, %v788_v42  ;;  %v1164_v9 = vld [vmem:[%s3710_s6 + $0x80] sm:$0xff] }
 0x232   :  { %v2467_v10 = vpop.f32.mrf.mxu1 }
 0x234   :  { %v929_v11 = vpop.f32.mrf.mxu1 }
 0x235   :  { %v969_v26 = vadd.f32 %v929_v11, %v793_v46  ;;  %v1149_v46 = vld [vmem:[%s3710_s6 + $0x8] sm:$0xff]  ;;  %v1179_v11 = vld [vmem:[%s3710_s6 + $0xf8] sm:$0xff] }
 0x236   :  { %v2470_v55 = vpop.f32.mrf.mxu1 }
 0x238   :  { %v934_v12 = vpop.f32.mrf.mxu1 }
 0x239   :  { %v970_v48 = vadd.f32 %v934_v12, %v3241_v50 }
 0x23a   :  { %v2473_v61 = vpop.f32.mrf.mxu1 }
 0x23b   :  { %v1178_v61 = vld [vmem:[%s3710_s6 + $0xf0] sm:$0xff] }
 0x23c   :  { %v3253_v13 = vpop.f32.mrf.mxu1 }
 0x23d   :  { %v971_v53 = vadd.f32 %v3253_v13, %v3243_v56  ;;  %v1177_v13 = vld [vmem:[%s3710_s6 + $0xe8] sm:$0xff] }
 0x23e   :  { %v2476_v57 = vpop.f32.mrf.mxu1 }
 0x23f   :  { %v1176_v57 = vld [vmem:[%s3710_s6 + $0xe0] sm:$0xff] }
 0x240   :  { %v3255_v14 = vpop.f32.mrf.mxu1 }
 0x242   :  { %v2479_v15 = vpop.f32.mrf.mxu1 }
 0x244   :  { %v3257_v16 = vpop.f32.mrf.mxu1 }
 0x246   :  { %v2482_v17 = vpop.f32.mrf.mxu1 }
 0x247   :  { %v1175_v17 = vld [vmem:[%s3710_s6 + $0xd8] sm:$0xff] }
 0x248   :  { %v3259_v59 = vpop.f32.mrf.mxu1 }
 0x24a   :  { %v2485_v18 = vpop.f32.mrf.mxu1 }
 0x24c   :  { %v959_v19 = vpop.f32.mrf.mxu1 }
 0x24d   :  { %v3261_v20 = vadd.f32 %v959_v19, %v823_v51  ;;  %v1166_v51 = vld [vmem:[%s3710_s6 + $0x90] sm:$0xff] }
 0x24e   :  { %v2488_v21 = vpop.f32.mrf.mxu1  ;;  %v1174_v19 = vld [vmem:[%s3710_s6 + $0xd0] sm:$0xff] }
 0x250   :  { %v3263_v22 = vpop.f32.mrf.mxu1 }
 0x252   :  { %v2491_v23 = vpop.f32.mrf.mxu1 }
 0x253   :  { %v1173_v23 = vld [vmem:[%s3710_s6 + $0xc8] sm:$0xff] }
 0x254   :  { %v1070_v24 = vpop.f32.mrf.mxu1 }
 0x255   :  { %v1114_v34 = vadd.f32 %v1070_v24, %v968_v31  ;;  %v972_v24 = vadd.f32 %v3255_v14, %v3245_v60  ;;  %v1186_v60 = vld [vmem:[%s3710_s6 + $0x130] sm:$0xff] }
 0x256   :  { %v2498_v25 = vpop.f32.mrf.mxu1 }
 0x257   :  { %v1130_v42 = vadd.f32 %v3268_v29, %v1114_v34  ;;  %v976_v25 = vadd.f32 %v3263_v22, %v3251_v8  ;;  %v1185_v8 = vld [vmem:[%s3710_s6 + $0x128] sm:$0xff]  ;;  %v1183_v34 = vld [vmem:[%s3710_s6 + $0x118] sm:$0xff] }
 0x258   :  { %v1075_v27 = vpop.f32.mrf.mxu1 }
 0x259   :  { %v1115_v28 = vadd.f32 %v1075_v27, %v969_v26  ;;  %v1139_v58 = vmax.f32 %v1130_v42, 0.0  ;;  %v1172_v26 = vld [vmem:[%s3710_s6 + $0xc0] sm:$0xff] }
 0x25a   :  { %v2501_v30 = vpop.f32.mrf.mxu1 }
 0x25b   :  { %v1131_v32 = vadd.f32 %v3268_v29, %v1115_v28  ;;  %v1187_v28 = vld [vmem:[%s3710_s6 + $0x138] sm:$0xff] }
 0x25c   :  { %v1080_v33 = vpop.f32.mrf.mxu1 }
 0x25d   :  { %v1140_v35 = vmax.f32 %v1131_v32, 0.0  ;;  %v1116_v47 = vadd.f32 %v1080_v33, %v970_v48  ;;  %v1184_v33 = vld [vmem:[%s3710_s6 + $0x120] sm:$0xff] }
 0x25e   :  { %v2504_v37 = vpop.f32.mrf.mxu1 }
 0x25f   :  { %2305 = vmatmul.mubr.msk.f32.vlgmr.msra.gmra.mxu1 %vm1220_vm4, %v1140_v35  ;;  %v1132_v5 = vadd.f32 %v3268_v29, %v1116_v47  ;;  %v1182_v37 = vld [vmem:[%s3710_s6 + $0x110] sm:$0xff]  ;;  %v1203_v47 = vld [vmem:[%s3710_s6 + $0x1b8] sm:$0xff] }
 0x260   :  { %1323 = vmatpush1.msra.mxu1 %v1154_v36  ;;  %v1085_v40 = vpop.f32.mrf.mxu1  ;;  %1362 = vmatprep.mubr.f32.mxu1 %v2532_v0 }
 0x261   :  { %1324 = vmatprep.subr.mxu1 %v1153_v38  ;;  %v1141_v55 = vmax.f32 %v1132_v5, 0.0  ;;  %v1117_v12 = vadd.f32 %v1085_v40, %v971_v53  ;;  %v1181_v38 = vld [vmem:[%s3710_s6 + $0x108] sm:$0xff]  ;;  %v1180_v40 = vld [vmem:[%s3710_s6 + $0x100] sm:$0xff] }
 0x262   :  { %1325 = vmatpush1.msra.mxu1 %v1152_v39  ;;  %v2507_v43 = vpop.f32.mrf.mxu1  ;;  %v973_v39 = vadd.f32 %v3257_v16, %v3247_v1  ;;  %v1194_v1 = vld [vmem:[%s3710_s6 + $0x170] sm:$0xff]  ;;  %v1193_v16 = vld [vmem:[%s3710_s6 + $0x168] sm:$0xff] }
 0x263   :  { %1326 = vmatprep.subr.mxu1 %v1151_v41  ;;  %v1133_v18 = vadd.f32 %v3268_v29, %v1117_v12  ;;  %v1195_v41 = vld [vmem:[%s3710_s6 + $0x178] sm:$0xff]  ;;  %v1192_v43 = vld [vmem:[%s3710_s6 + $0x160] sm:$0xff]  ;;  %v1197_v5 = vld [vmem:[%s3710_s6 + $0x188] sm:$0xff] }
 0x264   :  { %1327 = vmatpush1.msra.mxu1 %v1150_v44  ;;  %v1090_v52 = vpop.f32.mrf.mxu1  ;;  %v1206_v12 = vld [vmem:[%s3710_s6 + $0x1d0] sm:$0xff] }
 0x265   :  { %1328 = vmatprep.subr.mxu1 %v1149_v46  ;;  %v1142_v30 = vmax.f32 %v1133_v18, 0.0  ;;  %v1118_v31 = vadd.f32 %v1090_v52, %v972_v24  ;;  %v1191_v46 = vld [vmem:[%s3710_s6 + $0x158] sm:$0xff]  ;;  %v1189_v52 = vld [vmem:[%s3710_s6 + $0x148] sm:$0xff] }
 0x266   :  { %1329 = vmatpush1.msra.mxu1 %v1148_v45  ;;  %v2510_v50 = vpop.f32.mrf.mxu1  ;;  %v1190_v45 = vld [vmem:[%s3710_s6 + $0x150] sm:$0xff]  ;;  %v1946_v18 = vld [vmem:[%s3712_s8 + $0xe8] sm:$0xff]  ;;  %v1944_v24 = vld [vmem:[%s3712_s8 + $0xd8] sm:$0xff] }
 0x267   :  { %2306 = vmatmul.mubr.msk.f32.vlgmr.msra.gmra.mxu1 %vm1220_vm4, %v1139_v58  ;;  %1396 = vmatprep.subr.mxu1 %v1171_v54  ;;  %v1134_v35 = vadd.f32 %v3268_v29, %v1118_v31  ;;  %v974_v54 = vadd.f32 %v3259_v59, %v3249_v3  ;;  %v1188_v58 = vld [vmem:[%s3710_s6 + $0x140] sm:$0xff]  ;;  %v1201_v3 = vld [vmem:[%s3710_s6 + $0x1a8] sm:$0xff] }
 0x268   :  { %1397 = vmatpush1.msra.mxu1 %v1170_v62  ;;  %v3309_v49 = vpop.f32.mrf.mxu1  ;;  %1436 = vmatprep.mubr.f32.mxu1 %v2532_v0  ;;  %v1200_v59 = vld [vmem:[%s3710_s6 + $0x1a0] sm:$0xff] }
 0x269   :  { %1398 = vmatprep.subr.mxu1 %v1169_v63  ;;  %v1143_v42 = vmax.f32 %v1134_v35, 0.0  ;;  %v1119_v44 = vadd.f32 %v3309_v49, %v973_v39  ;;  %v1202_v63 = vld [vmem:[%s3710_s6 + $0x1b0] sm:$0xff]  ;;  %v1941_v31 = vld [vmem:[%s3712_s8 + $0xc0] sm:$0xff] }
 0x26a   :  { %1399 = vmatpush1.msra.mxu1 %v1168_v2  ;;  %v2513_v6 = vpop.f32.mrf.mxu1  ;;  %v1199_v2 = vld [vmem:[%s3710_s6 + $0x198] sm:$0xff]  ;;  %v1937_v35 = vld [vmem:[%s3712_s8 + $0xa0] sm:$0xff]  ;;  %v1935_v39 = vld [vmem:[%s3712_s8 + $0x90] sm:$0xff] }
 0x26b   :  { %1400 = vmatprep.subr.mxu1 %v1167_v4  ;;  %v1135_v48 = vadd.f32 %v3268_v29, %v1119_v44  ;;  %v1198_v4 = vld [vmem:[%s3710_s6 + $0x190] sm:$0xff]  ;;  %v1211_v6 = vld [vmem:[%s3710_s6 + $0x1f8] sm:$0xff]  ;;  %v1933_v44 = vld [vmem:[%s3712_s8 + $0x80] sm:$0xff] }
 0x26c   :  { %1401 = vmatpush1.msra.mxu1 %v1166_v51  ;;  %v3327_v10 = vpop.f32.mrf.mxu1  ;;  %v1196_v51 = vld [vmem:[%s3710_s6 + $0x180] sm:$0xff] }
 0x26d   :  { %1402 = vmatprep.subr.mxu1 %v1165_v7  ;;  %v1144_v62 = vmax.f32 %v1135_v48, 0.0  ;;  %v1120_v50 = vadd.f32 %v3327_v10, %v974_v54  ;;  %v1209_v10 = vld [vmem:[%s3710_s6 + $0x1e8] sm:$0xff]  ;;  %v2140_v48 = vld [vmem:[%s3715_s11 + $0xf8] sm:$0xff]  ;;  %v2137_v54 = vld [vmem:[%s3715_s11 + $0xe0] sm:$0xff] }
 0x26e   :  { %1403 = vmatpush1.msra.mxu1 %v1164_v9  ;;  %v2516_v56 = vpop.f32.mrf.mxu1  ;;  %v1210_v9 = vld [vmem:[%s3710_s6 + $0x1f0] sm:$0xff] }
 0x26f   :  { %2307 = vmatmul.mubr.msk.f32.vlgmr.msra.gmra.mxu1 %vm1220_vm4, %v1141_v55  ;;  %1472 = vmatprep.subr.mxu1 %v1179_v11  ;;  %v1136_v49 = vadd.f32 %v3268_v29, %v1120_v50  ;;  %v1208_v11 = vld [vmem:[%s3710_s6 + $0x1e0] sm:$0xff] }
 0x270   :  { %1473 = vmatpush1.msra.mxu1 %v1178_v61  ;;  %v3342_v15 = vpop.f32.mrf.mxu1  ;;  %1512 = vmatprep.mubr.f32.mxu1 %v2532_v0  ;;  %v1205_v61 = vld [vmem:[%s3710_s6 + $0x1c8] sm:$0xff]  ;;  %v1204_v56 = vld [vmem:[%s3710_s6 + $0x1c0] sm:$0xff] }
 0x271   :  { %1474 = vmatprep.subr.mxu1 %v1177_v13  ;;  %v1145_v7 = vmax.f32 %v1136_v49, 0.0  ;;  %v1121_v53 = vadd.f32 %v3342_v15, %v3261_v20  ;;  %v1207_v20 = vld [vmem:[%s3710_s6 + $0x1d8] sm:$0xff]  ;;  %v1947_v15 = vld [vmem:[%s3712_s8 + $0xf0] sm:$0xff]  ;;  %v2133_v50 = vld [vmem:[%s3715_s11 + $0xc0] sm:$0xff] }
 0x272   :  { %1475 = vmatpush1.msra.mxu1 %v1176_v57  ;;  %v2519_v21 = vpop.f32.mrf.mxu1  ;;  %v1932_v57 = vld [vmem:[%s3712_s8 + $0x78] sm:$0xff]  ;;  %v2127_v49 = vld [vmem:[%s3715_s11 + $0x90] sm:$0xff] }
 0x273   :  { %1476 = vmatprep.subr.mxu1 %v1175_v17  ;;  %v1137_v55 = vadd.f32 %v3268_v29, %v1121_v53  ;;  %v1931_v17 = vld [vmem:[%s3712_s8 + $0x70] sm:$0xff]  ;;  %v1945_v21 = vld [vmem:[%s3712_s8 + $0xe0] sm:$0xff] }
 0x274   :  { %1477 = vmatpush1.msra.mxu1 %v1174_v19  ;;  %v1110_v27 = vpop.f32.mrf.mxu1  ;;  %v1930_v19 = vld [vmem:[%s3712_s8 + $0x68] sm:$0xff]  ;;  %v2121_v53 = vld [vmem:[%s3715_s11 + $0x60] sm:$0xff] }
 0x275   :  { %v1122_v32 = vadd.f32 %v1110_v27, %v976_v25  ;;  %1478 = vmatprep.subr.mxu1 %v1173_v23  ;;  %v1146_v13 = vmax.f32 %v1137_v55, 0.0  ;;  %v1929_v23 = vld [vmem:[%s3712_s8 + $0x60] sm:$0xff]  ;;  %v1928_v25 = vld [vmem:[%s3712_s8 + $0x58] sm:$0xff]  ;;  %v1927_v27 = vld [vmem:[%s3712_s8 + $0x50] sm:$0xff] }
 0x276   :  { %1479 = vmatpush1.msra.mxu1 %v1172_v26  ;;  %v2522_v14 = vpop.f32.mrf.mxu1  ;;  %v1943_v26 = vld [vmem:[%s3712_s8 + $0xd0] sm:$0xff] }
 0x277   :  { %v1138_v22 = vadd.f32 %v3268_v29, %v1122_v32  ;;  %2308 = vmatmul.mubr.msk.f32.vlgmr.msra.gmra.mxu1 %vm1220_vm4, %v1142_v30  ;;  %1548 = vmatprep.subr.mxu1 %v1187_v28  ;;  %v1948_v29 = vld [vmem:[%s3712_s8 + $0xf8] sm:$0xff]  ;;  %v1942_v28 = vld [vmem:[%s3712_s8 + $0xc8] sm:$0xff]  ;;  %v1925_v32 = vld [vmem:[%s3712_s8 + $0x40] sm:$0xff] }
 0x278   :  { %1549 = vmatpush1.msra.mxu1 %v1186_v60  ;;  %1588 = vmatprep.mubr.f32.mxu1 %v2532_v0  ;;  %v1926_v30 = vld [vmem:[%s3712_s8 + $0x48] sm:$0xff]  ;;  %v1940_v60 = vld [vmem:[%s3712_s8 + $0xb8] sm:$0xff]  ;;  %v1939_v14 = vld [vmem:[%s3712_s8 + $0xb0] sm:$0xff] }
 0x279   :  { %v1147_v36 = vmax.f32 %v1138_v22, 0.0  ;;  %1550 = vmatprep.subr.mxu1 %v1185_v8  ;;  %2364 = vmatprep.subr.mxu0 %v1948_v29  ;;  %v1924_v8 = vld [vmem:[%s3712_s8 + $0x38] sm:$0xff]  ;;  %v1923_v22 = vld [vmem:[%s3712_s8 + $0x30] sm:$0xff] }
 0x27a   :  { %1551 = vmatpush1.msra.mxu1 %v1184_v33  ;;  %v1938_v33 = vld [vmem:[%s3712_s8 + $0xa8] sm:$0xff] }
 0x27b   :  { %1552 = vmatprep.subr.mxu1 %v1183_v34  ;;  %2313 = vmatmul.mubr.msk.f32.vlgmr.msra.gmra.mxu0 %vm1220_vm4, %v1147_v36  ;;  %v1922_v34 = vld [vmem:[%s3712_s8 + $0x28] sm:$0xff]  ;;  %v1921_v36 = vld [vmem:[%s3712_s8 + $0x20] sm:$0xff] }
 0x27c   :  { %1553 = vmatpush1.msra.mxu1 %v1182_v37  ;;  %2365 = vmatpush3.msra.mxu0 %v1932_v57  ;;  %v1936_v37 = vld [vmem:[%s3712_s8 + $0x98] sm:$0xff] }
 0x27d   :  { %1554 = vmatprep.subr.mxu1 %v1181_v38  ;;  %2366 = vmatprep.subr.mxu0 %v1947_v15  ;;  %v1920_v38 = vld [vmem:[%s3712_s8 + $0x18] sm:$0xff] }
 0x27e   :  { %1555 = vmatpush1.msra.mxu1 %v1180_v40  ;;  %2367 = vmatpush3.msra.mxu0 %v1931_v17  ;;  %v1919_v40 = vld [vmem:[%s3712_s8 + $0x10] sm:$0xff] }
 0x27f   :  { %2309 = vmatmul.mubr.msk.f32.vlgmr.msra.gmra.mxu1 %vm1220_vm4, %v1143_v42  ;;  %1624 = vmatprep.subr.mxu1 %v1195_v41  ;;  %v1934_v41 = vld [vmem:[%s3712_s8 + $0x88] sm:$0xff] }
 0x280   :  { %1625 = vmatpush1.msra.mxu1 %v1194_v1  ;;  %1664 = vmatprep.mubr.f32.mxu1 %v2532_v0  ;;  %v1918_v42 = vld [vmem:[%s3712_s8 + $0x8] sm:$0xff] }
 0x281   :  { %1626 = vmatprep.subr.mxu1 %v1193_v16  ;;  %2368 = vmatprep.subr.mxu0 %v1946_v18  ;;  %v1951_v1 = vld [vmem:[%s3713_s9 + $0x8] sm:$0xf]  ;;  %v1917_v16 = vld [vmem:[%s3712_s8] sm:$0xff]  ;;  %v1903_v18 = vlaneseq }
 0x282   :  { %1627 = vmatpush1.msra.mxu1 %v1192_v43  ;;  %2369 = vmatpush3.msra.mxu0 %v1930_v19  ;;  %v1950_v43 = vld [vmem:[%s3713_s9] sm:$0xff] }
 0x283   :  { %1628 = vmatprep.subr.mxu1 %v1191_v46  ;;  %2370 = vmatprep.subr.mxu0 %v1945_v21  ;;  %v1949_v46 = vld [vmem:[%s3714_s1] sm:$0xff] }
 0x284   :  { %1629 = vmatpush1.msra.mxu1 %v1190_v45  ;;  %2371 = vmatpush3.msra.mxu0 %v1929_v23  ;;  %v2139_v45 = vld [vmem:[%s3715_s11 + $0xf0] sm:$0xff] }
 0x285   :  { %1630 = vmatprep.subr.mxu1 %v1189_v52  ;;  %2372 = vmatprep.subr.mxu0 %v1944_v24  ;;  %v2138_v52 = vld [vmem:[%s3715_s11 + $0xe8] sm:$0xff] }
 0x286   :  { %1631 = vmatpush1.msra.mxu1 %v1188_v58  ;;  %2373 = vmatpush3.msra.mxu0 %v1928_v25  ;;  %v2136_v58 = vld [vmem:[%s3715_s11 + $0xd8] sm:$0xff] }
 0x287   :  { %2310 = vmatmul.mubr.msk.f32.vlgmr.msra.gmra.mxu1 %vm1220_vm4, %v1144_v62  ;;  %1700 = vmatprep.subr.mxu1 %v1203_v47  ;;  %v2135_v47 = vld [vmem:[%s3715_s11 + $0xd0] sm:$0xff]  ;;  %v2134_v62 = vld [vmem:[%s3715_s11 + $0xc8] sm:$0xff] }
 0x288   :  { %1701 = vmatpush1.msra.mxu1 %v1202_v63  ;;  %1740 = vmatprep.mubr.f32.mxu1 %v2532_v0  ;;  %v2131_v63 = vld [vmem:[%s3715_s11 + $0xb0] sm:$0xff] }
 0x289   :  { %1702 = vmatprep.subr.mxu1 %v1201_v3  ;;  %2374 = vmatprep.subr.mxu0 %v1943_v26  ;;  %v2130_v3 = vld [vmem:[%s3715_s11 + $0xa8] sm:$0xff] }
 0x28a   :  { %1703 = vmatpush1.msra.mxu1 %v1200_v59  ;;  %2375 = vmatpush3.msra.mxu0 %v1927_v27  ;;  %v2129_v59 = vld [vmem:[%s3715_s11 + $0xa0] sm:$0xff]  ;;  %v3654_v27 = vshrl.u32 %v1903_v18, 7 }
 0x28b   :  { %1704 = vmatprep.subr.mxu1 %v1199_v2  ;;  %2376 = vmatprep.subr.mxu0 %v1942_v28  ;;  %v2128_v2 = vld [vmem:[%s3715_s11 + $0x98] sm:$0xff] }
 0x28c   :  { %1705 = vmatpush1.msra.mxu1 %v1198_v4  ;;  %2377 = vmatpush3.msra.mxu0 %v1926_v30  ;;  %v2126_v4 = vld [vmem:[%s3715_s11 + $0x88] sm:$0xff] }
 0x28d   :  { %1706 = vmatprep.subr.mxu1 %v1197_v5  ;;  %2378 = vmatprep.subr.mxu0 %v1941_v31  ;;  %v2125_v5 = vld [vmem:[%s3715_s11 + $0x80] sm:$0xff] }
 0x28e   :  { %1707 = vmatpush1.msra.mxu1 %v1196_v51  ;;  %2379 = vmatpush3.msra.mxu0 %v1925_v32  ;;  %v2124_v51 = vld [vmem:[%s3715_s11 + $0x78] sm:$0xff] }
 0x28f   :  { %2311 = vmatmul.mubr.msk.f32.vlgmr.msra.gmra.mxu1 %vm1220_vm4, %v1145_v7  ;;  %1776 = vmatprep.subr.mxu1 %v1211_v6  ;;  %v2123_v6 = vld [vmem:[%s3715_s11 + $0x70] sm:$0xff]  ;;  %v2122_v7 = vld [vmem:[%s3715_s11 + $0x68] sm:$0xff] }
 0x290   :  { %1777 = vmatpush1.msra.mxu1 %v1210_v9  ;;  %1816 = vmatprep.mubr.f32.mxu1 %v2532_v0  ;;  %v2120_v9 = vld [vmem:[%s3715_s11 + $0x58] sm:$0xff] }
 0x291   :  { %1778 = vmatprep.subr.mxu1 %v1209_v10  ;;  %2380 = vmatprep.subr.mxu0 %v1940_v60 }
 0x292   :  { %1779 = vmatpush1.msra.mxu1 %v1208_v11  ;;  %2381 = vmatpush3.msra.mxu0 %v1924_v8  ;;  %v1905_v8 = vsub.s32 0, %v3654_v27 }
 0x293   :  { %1780 = vmatprep.subr.mxu1 %v1207_v20  ;;  %2382 = vmatprep.subr.mxu0 %v1939_v14 }
 0x294   :  { %1781 = vmatpush1.msra.mxu1 %v1206_v12  ;;  %2383 = vmatpush3.msra.mxu0 %v1923_v22 }
 0x295   :  { %1782 = vmatprep.subr.mxu1 %v1205_v61  ;;  %2384 = vmatprep.subr.mxu0 %v1938_v33  ;;  %v1901_v33 = vld [vmem:[%s3716_s7] sm:$0x3] }
 0x296   :  { %1783 = vmatpush1.msra.mxu1 %v1204_v56  ;;  %2385 = vmatpush3.msra.mxu0 %v1922_v34  ;;  %v1909_v34 = vsub.s32 1, %v3654_v27 }
 0x297   :  { %2312 = vmatmul.mubr.msk.f32.vlgmr.msra.gmra.mxu1 %vm1220_vm4, %v1146_v13  ;;  %2523 = vmatprep.subr.mxu1 %v2532_v0 }
 0x298   :  { %2527 = vmatprep.mubr.msk.f32.mxu1 %vm2533_vm2, %v2532_v0  ;;  %2386 = vmatprep.subr.mxu0 %v1937_v35 }
 0x299   :  { %2387 = vmatpush3.msra.mxu0 %v1921_v36  ;;  %2524 = vmatpush3.msk.msra.mxu1 %vm1956_vm5, %v1951_v1 }
 0x29a   :  { %2388 = vmatprep.subr.mxu0 %v1936_v37  ;;  %2525 = vmatprep.subr.mxu1 %v2532_v0 }
 0x29b   :  { %2389 = vmatpush3.msra.mxu0 %v1920_v38  ;;  %2526 = vmatpush3.msra.mxu1 %v1950_v43 }
 0x29c   :  { %2390 = vmatprep.subr.mxu0 %v1935_v39  ;;  %2528 = vmatmul.mubr.msk.f32.vlgmr.msra.gmra.mxu1 %vm1952_vm6, %v1949_v46  ;;  %v1906_v39 = vrot.slane %v1901_v33, %v1905_v8 }
 0x29d   :  { %2391 = vmatpush3.msra.mxu0 %v1919_v40  ;;  %2153 = vmatprep.subr.mxu1 %v2140_v48 }
 0x29e   :  { %2392 = vmatprep.subr.mxu0 %v1934_v41  ;;  %2154 = vmatpush1.msra.mxu1 %v2139_v45 }
 0x29f   :  { %2393 = vmatpush3.msra.mxu0 %v1918_v42  ;;  %2217 = vmatprep.mubr.f32.mxu1 %v2532_v0  ;;  %v2132_v0 = vld [vmem:[%s3715_s11 + $0xb8] sm:$0xff] }
 0x2a0   :  { %2394 = vmatprep.subr.mxu0 %v1933_v44  ;;  %2155 = vmatprep.subr.mxu1 %v2138_v52  ;;  %v1910_v44 = vrot.slane %v1901_v33, %v1909_v34  ;;  %v2119_v52 = vld [vmem:[%s3715_s11 + $0x50] sm:$0xff] }
 0x2a1   :  { %2395 = vmatpush3.msra.mxu0 %v1917_v16  ;;  %2156 = vmatpush1.msra.mxu1 %v2137_v54  ;;  %v2118_v54 = vld [vmem:[%s3715_s11 + $0x48] sm:$0xff] }
 0x2a2   :  { %2157 = vmatprep.subr.mxu1 %v2136_v58  ;;  %v2117_v58 = vld [vmem:[%s3715_s11 + $0x40] sm:$0xff] }
 0x2a3   :  { %2158 = vmatpush1.msra.mxu1 %v2135_v47 }
 0x2a4   :  { %2159 = vmatprep.subr.mxu1 %v2134_v62  ;;  %v2116_v62 = vld [vmem:[%s3715_s11 + $0x38] sm:$0xff] }
 0x2a5   :  { %2160 = vmatpush1.msra.mxu1 %v2133_v50  ;;  %v2115_v50 = vld [vmem:[%s3715_s11 + $0x30] sm:$0xff] }
 0x2a6   :  { %2161 = vmatprep.subr.mxu1 %v2132_v0 }
 0x2a7   :  { %2162 = vmatpush1.msra.mxu1 %v2131_v63  ;;  %v2114_v63 = vld [vmem:[%s3715_s11 + $0x28] sm:$0xff] }
 0x2a8   :  { %2163 = vmatprep.subr.mxu1 %v2130_v3  ;;  %v2113_v3 = vld [vmem:[%s3715_s11 + $0x20] sm:$0xff] }
 0x2a9   :  { %2164 = vmatpush1.msra.mxu1 %v2129_v59  ;;  %v2112_v59 = vld [vmem:[%s3715_s11 + $0x18] sm:$0xff] }
 0x2aa   :  { %2165 = vmatprep.subr.mxu1 %v2128_v2  ;;  %v2111_v2 = vld [vmem:[%s3715_s11 + $0x10] sm:$0xff] }
 0x2ab   :  { %2166 = vmatpush1.msra.mxu1 %v2127_v49  ;;  %v2110_v49 = vld [vmem:[%s3715_s11 + $0x8] sm:$0xff] }
 0x2ac   :  { %2167 = vmatprep.subr.mxu1 %v2126_v4  ;;  %v2109_v4 = vld [vmem:[%s3715_s11] sm:$0xff] }
 0x2ad   :  { %2168 = vmatpush1.msra.mxu1 %v2125_v5 }
 0x2ae   :  { %2169 = vmatprep.subr.mxu1 %v2124_v51 }
 0x2af   :  { %2170 = vmatpush1.msra.mxu1 %v2123_v6 }
 0x2b0   :  { %2171 = vmatprep.subr.mxu1 %v2122_v7  ;;  %v2316_v7 = vld [vmem:[%s3717_s10] ss:$0 sm:$0xff] }
 0x2b1   :  { %2172 = vmatpush1.msra.mxu1 %v2121_v53 }
 0x2b2   :  { %2173 = vmatprep.subr.mxu1 %v2120_v9 }
 0x2b3   :  { %2174 = vmatpush1.msra.mxu1 %v2119_v52 }
 0x2b4   :  { %2175 = vmatprep.subr.mxu1 %v2118_v54 }
 0x2b5   :  { %2176 = vmatpush1.msra.mxu1 %v2117_v58 }
 0x2b6   :  { %2177 = vmatprep.subr.mxu1 %v2116_v62 }
 0x2b7   :  { %2178 = vmatpush1.msra.mxu1 %v2115_v50 }
 0x2b8   :  { %2179 = vmatprep.subr.mxu1 %v2114_v63 }
 0x2b9   :  { %2180 = vmatpush1.msra.mxu1 %v2113_v3 }
 0x2ba   :  { %2181 = vmatprep.subr.mxu1 %v2112_v59 }
 0x2bb   :  { %2182 = vmatpush1.msra.mxu1 %v2111_v2 }
 0x2bc   :  { %2183 = vmatprep.subr.mxu1 %v2110_v49 }
 0x2bd   :  { %2184 = vmatpush1.msra.mxu1 %v2109_v4 }
 0x31f   :  { %v1290_v10 = vpop.f32.mrf.mxu1 }
 0x321   :  { %v1292_v11 = vpop.f32.mrf.mxu1 }
 0x327   :  { %v1364_v20 = vpop.f32.mrf.mxu1 }
 0x328   :  { %v1365_v17 = vadd.f32 %v1364_v20, %v1290_v10 }
 0x329   :  { %v1366_v55 = vpop.f32.mrf.mxu1 }
 0x32a   :  { %v1367_v19 = vadd.f32 %v1366_v55, %v1292_v11  ;;  %v2141_v11 = vld [vmem:[%s3718_s12] sm:$0x3] }
 0x32b   :  { %v2146_v20 = vrot.slane %v2141_v11, %v1905_v8  ;;  %v2150_v55 = vrot.slane %v2141_v11, %v1909_v34 }
 0x32f   :  { %v1438_v12 = vpop.f32.mrf.mxu1 }
 0x330   :  { %v1443_v21 = vadd.f32 %v1438_v12, %v1365_v17 }
 0x331   :  { %v1440_v61 = vpop.f32.mrf.mxu1 }
 0x332   :  { %v1444_v24 = vadd.f32 %v1440_v61, %v1367_v19 }
 0x337   :  { %v1514_v56 = vpop.f32.mrf.mxu1 }
 0x338   :  { %v1519_v25 = vadd.f32 %v1514_v56, %v1443_v21 }
 0x339   :  { %v1516_v13 = vpop.f32.mrf.mxu1 }
 0x33a   :  { %v1520_v28 = vadd.f32 %v1516_v13, %v1444_v24 }
 0x33b   :  { %v1894_v35 = vpop.f32.mrf.mxu0 }
 0x33d   :  { %v1896_v1 = vpop.f32.mrf.mxu0 }
 0x33f   :  { %v1590_v29 = vpop.f32.mrf.mxu1 }
 0x340   :  { %v1595_v30 = vadd.f32 %v1590_v29, %v1519_v25 }
 0x341   :  { %v1592_v57 = vpop.f32.mrf.mxu1 }
 0x342   :  { %v1596_v31 = vadd.f32 %v1592_v57, %v1520_v28 }
 0x347   :  { %v1666_v15 = vpop.f32.mrf.mxu1 }
 0x348   :  { %v1671_v32 = vadd.f32 %v1666_v15, %v1595_v30 }
 0x349   :  { %v1668_v23 = vpop.f32.mrf.mxu1 }
 0x34a   :  { %v1672_v14 = vadd.f32 %v1668_v23, %v1596_v31 }
 0x34f   :  { %v1742_v26 = vpop.f32.mrf.mxu1 }
 0x350   :  { %v1747_v22 = vadd.f32 %v1742_v26, %v1671_v32 }
 0x351   :  { %v1744_v60 = vpop.f32.mrf.mxu1 }
 0x352   :  { %v1748_v37 = vadd.f32 %v1744_v60, %v1672_v14 }
 0x357   :  { %v1818_v36 = vpop.f32.mrf.mxu1 }
 0x358   :  { %v1823_v38 = vadd.f32 %v1818_v36, %v1747_v22 }
 0x359   :  { %v1820_v40 = vpop.f32.mrf.mxu1 }
 0x35a   :  { %v1899_v41 = vadd.f32 %v1894_v35, %v1823_v38  ;;  %v1824_v42 = vadd.f32 %v1820_v40, %v1748_v37 }
 0x35c   :  { %v1900_v16 = vadd.f32 %v1896_v1, %v1824_v42  ;;  %v1913_v43 = vadd.f32 %v1906_v39, %v1899_v41  ;;  %v2026_v47 = vpop.f32.mrf.mxu1 }
 0x35e   :  { %v1914_v46 = vadd.f32 %v1910_v44, %v1900_v16  ;;  %v1915_v45 = vmax.f32 %v1913_v43, 0.0  ;;  %v2529_v0 = vpop.f32.mrf.mxu1 }
 0x360   :  { %v1916_v48 = vmax.f32 %v1914_v46, 0.0 }
 0x362   :  { %2094 = vmatprep.mubr.f32.mxu0 %v1916_v48 }
 0x363   :  { %2095 = vmatmul.mubr.f32.vlgmr.msra.gmra.mxu0 %v1915_v45 }
 0x423   :  { %v2396_v5 = vpop.f32.mrf.mxu0 }
 0x425   :  { %v2397_v51 = vpop.f32.mrf.mxu0 }
 0x426   :  { %v2398_v6 = vadd.f32 %v2397_v51, %v2396_v5 }
 0x428   :  { %v2097_v53 = vadd.f32 %v2398_v6, %v2026_v47 }
 0x42a   :  { %v2107_v9 = vadd.f32 %v2316_v7, %v2097_v53 }
 0x42c   :  { %v2108_v10 = vmax.f32 %v2107_v9, 0.0 }
 0x42e   :  { %2218 = vmatmul.mubr.f32.vlgmr.msra.gmra.mxu1 %v2108_v10 }
 0x4ee   :  { %v2219_v12 = vpop.f32.mrf.mxu1 }
 0x4ef   :  { %v2220_v61 = vadd.f32 %v2219_v12, %v2146_v20 }
 0x4f0   :  { %v2221_v56 = vpop.f32.mrf.mxu1 }
 0x4f1   :  { %2224 = vst [vmem:[%s3719_s13] sm:$0xff] %v2220_v61  ;;  %v2222_v13 = vadd.f32 %v2221_v56, %v2150_v55 }
 0x4f3   :  { %2225 = vst [vmem:[%s3719_s13 + $0x8] sm:$0xff] %v2222_v13 }

</bundles_post_ra>
